<compile_context>
chip_gen: v7x
topology: tpu7x:2x2x1
jax: 0.10.0
libtpu: 0.0.40
codegen_flags: <defaults>
</compile_context>

<pallas_src>
import jax
import jax.numpy as jnp
from jax.experimental import pallas as pl
from jax.experimental.pallas import tpu as pltpu

# ----------------------------- hyperparameters ------------------------------
N_CLASSES = 10
CHANNELS = 1
IMG_H = 16
IMG_W = 16
HIDDEN = 512
BATCH = 8

IMG_FLAT = CHANNELS * IMG_H * IMG_W          # 256 = 2 x 128 lanes
OUT_LANES = 128                              # lane-dense output slab (col 0 = logit)
EMB_ROWS = 128                               # label table padded to one lane width


# ------------------------------- Pallas kernel -------------------------------
def _disc_mlp_kernel(x_ref, lab_ref, emb_hi_ref, emb_lo_ref, w1_ref, w2_ref,
                     w3_ref, w4_ref, b23_ref, b4_ref, o_ref):
    """One tb-row batch block of the MLP. Weights are VMEM-resident across blocks."""

    def leaky_relu(v):                       # f32 elementwise on the VPU
        return jnp.where(v > 0, v, 0.2 * v)

    tb = x_ref.shape[0]

    # Layer-1 label bias: build a one-hot from the streamed int32 labels and
    # matmul it against the folded (emb @ W1_emb + b1) table.  The table is kept
    # as bf16 hi + bf16 lo so the selected row is accurate to ~2^-17 relative
    # (effectively the f32 table), with only two tiny MXU passes.
    lab = lab_ref[...]                                             # (tb, 1) int32
    classes = jax.lax.broadcasted_iota(jnp.int32, (tb, EMB_ROWS), 1)
    onehot = (lab == classes).astype(jnp.bfloat16)                 # (tb, 128) bf16
    emb_bias = (jnp.dot(onehot, emb_hi_ref[...], preferred_element_type=jnp.float32)
                + jnp.dot(onehot, emb_lo_ref[...], preferred_element_type=jnp.float32))

    # Layer 1: image streams as f32 (no wrapper convert pass); pack to bf16 on
    # the VPU right before the MXU.  b1 is already folded into emb_bias.
    x = x_ref[...].astype(jnp.bfloat16)
    h = jnp.dot(x, w1_ref[...], preferred_element_type=jnp.float32)
    h = leaky_relu(h + emb_bias)

    # Layer 2 (Dropout(0.4) is identity at inference).
    h = jnp.dot(h.astype(jnp.bfloat16), w2_ref[...],
                preferred_element_type=jnp.float32)
    h = leaky_relu(h + b23_ref[0:1, :])

    # Layer 3 (Dropout(0.4) is identity at inference).
    h = jnp.dot(h.astype(jnp.bfloat16), w3_ref[...],
                preferred_element_type=jnp.float32)
    h = leaky_relu(h + b23_ref[1:2, :])

    # Layer 4: N=1 would waste the MXU -> VPU multiply + XLU lane reduce,
    # stored as a lane-dense bf16 slab (every lane carries the logit).
    logit = jnp.sum(h * w4_ref[...], axis=-1, keepdims=True) + b4_ref[0, 0]
    o_ref[...] = jnp.broadcast_to(logit, o_ref.shape).astype(o_ref.dtype)


def _round_up(n, m):
    return (n + m - 1) // m * m


def _choose_batch_tile(b):
    """Pick (tb, b_pad).  Large tiles amortize per-step grid overhead; for
    b > 128 keep at least two blocks so both v7x TensorCores get work."""
    if b <= 128:
        tb = _round_up(b, 8)                       # single block
        return tb, tb
    tb = min(512, _round_up(pl.cdiv(b, 2), 8))     # >= 2 blocks, tile up to 512
    return tb, _round_up(b, tb)


def discriminator_mlp(img_flat_f32, labels_i32, kp):
    """img_flat_f32: (B, IMG_FLAT) f32; labels_i32: (B,) int32 -> (B, 1) f32."""
    b = img_flat_f32.shape[0]
    tb, b_pad = _choose_batch_tile(b)
    nblk = b_pad // tb
    if b_pad != b:
        img_flat_f32 = jnp.pad(img_flat_f32, ((0, b_pad - b), (0, 0)))
        labels_i32 = jnp.pad(labels_i32, ((0, b_pad - b),))
    labels_col = labels_i32.reshape(b_pad, 1).astype(jnp.int32)

    row = lambda i: (i, 0)        # batch-streamed operands
    const = lambda i: (0, 0)      # weights: same block every step -> stay in VMEM

    if nblk >= 3:
        # Per-step compute is short; a 3-deep pipeline hides DMA latency at
        # block boundaries once there are several batch blocks to stream.
        x_spec = pl.BlockSpec((tb, IMG_FLAT), row, pipeline_mode=pl.Buffered(3))
    else:
        x_spec = pl.BlockSpec((tb, IMG_FLAT), row)

    out = pl.pallas_call(
        _disc_mlp_kernel,
        out_shape=jax.ShapeDtypeStruct((b_pad, OUT_LANES), jnp.bfloat16),
        grid=(nblk,),
        in_specs=[
            x_spec,                                           # x (f32, streamed)
            pl.BlockSpec((tb, 1), row),                       # labels (int32)
            pl.BlockSpec((EMB_ROWS, HIDDEN), const),          # emb table hi (bf16)
            pl.BlockSpec((EMB_ROWS, HIDDEN), const),          # emb table lo (bf16)
            pl.BlockSpec((IMG_FLAT, HIDDEN), const),          # w1_img  (bf16)
            pl.BlockSpec((HIDDEN, HIDDEN), const),            # w2      (bf16)
            pl.BlockSpec((HIDDEN, HIDDEN), const),            # w3      (bf16)
            pl.BlockSpec((1, HIDDEN), const),                 # w4 row  (f32)
            pl.BlockSpec((2, HIDDEN), const),                 # [b2; b3] (f32)
            pl.BlockSpec(memory_space=pltpu.MemorySpace.SMEM),  # b4 scalar
        ],
        out_specs=pl.BlockSpec((tb, OUT_LANES), row),
        compiler_params=pltpu.CompilerParams(
            dimension_semantics=("parallel",)),  # shard batch blocks across TCs (v7x)
    )(img_flat_f32, labels_col, kp["emb_hi"], kp["emb_lo"], kp["w1_img"],
      kp["w2"], kp["w3"], kp["w4_row"], kp["b23"], kp["b4"])
    # Column 0 of the lane-dense slab holds the logit; padded rows are dropped.
    return out[:b, :1].astype(jnp.float32)


# ------------------------------- JAX glue ------------------------------------
def init_params(key):
    """Deterministic init mimicking PyTorch default Linear / Embedding init (f32)."""
    keys = jax.random.split(key, 9)

    def linear(kw, kb, fan_in, fan_out):
        bound = 1.0 / jnp.sqrt(jnp.float32(fan_in))
        w = jax.random.uniform(kw, (fan_in, fan_out), jnp.float32, -bound, bound)
        b = jax.random.uniform(kb, (1, fan_out), jnp.float32, -bound, bound)
        return w, b

    emb = jax.random.normal(keys[0], (N_CLASSES, N_CLASSES), jnp.float32)
    w1, b1 = linear(keys[1], keys[2], IMG_FLAT + N_CLASSES, HIDDEN)
    w2, b2 = linear(keys[3], keys[4], HIDDEN, HIDDEN)
    w3, b3 = linear(keys[5], keys[6], HIDDEN, HIDDEN)
    w4, b4 = linear(keys[7], keys[8], HIDDEN, 1)
    return dict(emb=emb, w1=w1, b1=b1, w2=w2, b2=b2, w3=w3, b3=b3, w4=w4, b4=b4)


def prepare_kernel_params(p):
    """Fold label embedding (and b1) through layer 1; split the table hi/lo bf16;
    cast matmul weights to bf16."""
    w1_img = p["w1"][:IMG_FLAT, :]                         # (256, 512)
    w1_emb = p["w1"][IMG_FLAT:, :]                         # (n_classes, 512)
    emb_h1 = p["emb"] @ w1_emb + p["b1"]                   # (n_classes, 512) f32
    emb_h1 = jnp.pad(emb_h1, ((0, EMB_ROWS - N_CLASSES), (0, 0)))  # (128, 512)
    emb_hi = emb_h1.astype(jnp.bfloat16)
    emb_lo = (emb_h1 - emb_hi.astype(jnp.float32)).astype(jnp.bfloat16)
    return dict(
        emb_hi=emb_hi,                                     # hi + lo ~= f32 table
        emb_lo=emb_lo,
        w1_img=w1_img.astype(jnp.bfloat16),
        w2=p["w2"].astype(jnp.bfloat16),
        w3=p["w3"].astype(jnp.bfloat16),
        w4_row=p["w4"].reshape(1, HIDDEN),                 # f32 row for VPU mul+reduce
        b23=jnp.concatenate([p["b2"], p["b3"]], axis=0),   # (2, 512) f32
        b4=p["b4"].reshape(1, 1),                          # scalar -> SMEM
    )


def discriminator_forward(img, labels, kp):
    """img: (B, C, H, W) f32 (NCHW, as in PyTorch); labels: (B,) int -> (B, 1) f32."""
    b = img.shape[0]
    img_flat = img.reshape(b, -1)            # stays f32; bf16 pack happens in-kernel
    return discriminator_mlp(img_flat, labels.astype(jnp.int32), kp)


# Pure-JAX reference implementing the same math (bf16 matmul operands, f32
# accumulation, embedding + b1 folded through layer 1, f32 label-bias table).
def discriminator_reference(img, labels, p):
    b = img.shape[0]
    lrelu = lambda v: jnp.where(v > 0, v, 0.2 * v)
    bdot = lambda a, w: jnp.dot(a.astype(jnp.bfloat16), w.astype(jnp.bfloat16),
                                preferred_element_type=jnp.float32)
    img_flat = img.reshape(b, -1)
    emb_bias = (p["emb"] @ p["w1"][IMG_FLAT:, :] + p["b1"])[labels]
    h = lrelu(bdot(img_flat, p["w1"][:IMG_FLAT, :]) + emb_bias)
    h = lrelu(bdot(h, p["w2"]) + p["b2"])
    h = lrelu(bdot(h, p["w3"]) + p["b3"])
    return (jnp.sum(h * p["w4"].reshape(1, HIDDEN), axis=-1, keepdims=True)
            + p["b4"].reshape(1, 1))


if __name__ == "__main__":
    key = jax.random.PRNGKey(0)
    k_img, k_lab, k_par = jax.random.split(key, 3)

    params = init_params(k_par)
    kparams = prepare_kernel_params(params)

    # Small serving-style batch: single block, single grid step.
    img = jax.random.normal(k_img, (BATCH, CHANNELS, IMG_H, IMG_W), jnp.float32)
    labels = jax.random.randint(k_lab, (BATCH,), 0, N_CLASSES, jnp.int32)
    out = jax.block_until_ready(discriminator_forward(img, labels, kparams))
    ref = discriminator_reference(img, labels, params)
    assert out.shape == (BATCH, 1), out.shape
    # Tolerance covers the bf16 rounding of the stored output slab (~2^-9 rel).
    assert jnp.allclose(out, ref, atol=1e-2, rtol=1e-2), (out, ref)

    # Larger batch exercising the multi-block "parallel" path + batch padding.
    big_b = 150
    k_img2, k_lab2 = jax.random.split(jax.random.PRNGKey(1))
    img2 = jax.random.normal(k_img2, (big_b, CHANNELS, IMG_H, IMG_W), jnp.float32)
    labels2 = jax.random.randint(k_lab2, (big_b,), 0, N_CLASSES, jnp.int32)
    out2 = jax.block_until_ready(discriminator_forward(img2, labels2, kparams))
    ref2 = discriminator_reference(img2, labels2, params)
    assert out2.shape == (big_b, 1), out2.shape
    assert jnp.allclose(out2, ref2, atol=1e-2, rtol=1e-2), (out2, ref2)

    print("KERNEL_OK")
</pallas_src>

<mosaic_0001>
module attributes {stable_mosaic.version = 11 : i64} {
  func.func @_disc_mlp_kernel(%arg0: i32, %arg1: memref<8x256xf32, #tpu.memory_space<vmem>>, %arg2: memref<8x1xi32, #tpu.memory_space<vmem>>, %arg3: memref<128x512xbf16, #tpu.memory_space<vmem>>, %arg4: memref<128x512xbf16, #tpu.memory_space<vmem>>, %arg5: memref<256x512xbf16, #tpu.memory_space<vmem>>, %arg6: memref<512x512xbf16, #tpu.memory_space<vmem>>, %arg7: memref<512x512xbf16, #tpu.memory_space<vmem>>, %arg8: memref<1x512xf32, #tpu.memory_space<vmem>>, %arg9: memref<2x512xf32, #tpu.memory_space<vmem>>, %arg10: memref<1x1xf32, #tpu.memory_space<smem>>, %arg11: memref<8x128xbf16, #tpu.memory_space<vmem>>) attributes {dimension_semantics = [#tpu.dimension_semantics<parallel>], iteration_bounds = array<i64: 1>, scalar_prefetch = 0 : i64, scratch_operands = 0 : i64, tpu.core_type = #tpu.core_type<tc>, window_params = [{transform_indices = @transform_0, window_bounds = array<i64: 8, 256>}, {transform_indices = @transform_1, window_bounds = array<i64: 8, 1>}, {pipeline_mode = #tpu.pipeline_mode<synchronous>, transform_indices = @transform_2, window_bounds = array<i64: 128, 512>}, {pipeline_mode = #tpu.pipeline_mode<synchronous>, transform_indices = @transform_3, window_bounds = array<i64: 128, 512>}, {pipeline_mode = #tpu.pipeline_mode<synchronous>, transform_indices = @transform_4, window_bounds = array<i64: 256, 512>}, {pipeline_mode = #tpu.pipeline_mode<synchronous>, transform_indices = @transform_5, window_bounds = array<i64: 512, 512>}, {pipeline_mode = #tpu.pipeline_mode<synchronous>, transform_indices = @transform_6, window_bounds = array<i64: 512, 512>}, {pipeline_mode = #tpu.pipeline_mode<synchronous>, transform_indices = @transform_7, window_bounds = array<i64: 1, 512>}, {pipeline_mode = #tpu.pipeline_mode<synchronous>, transform_indices = @transform_8, window_bounds = array<i64: 2, 512>}, {transform_indices = @transform_9, window_bounds = array<i64: 1, 1>}, {transform_indices = @transform_10, window_bounds = array<i64: 8, 128>}]} {
    %c0 = arith.constant 0 : index
    %c0_0 = arith.constant 0 : index
    %0 = vector.load %arg2[%c0, %c0_0] : memref<8x1xi32, #tpu.memory_space<vmem>>, vector<8x1xi32>
    %1 = tpu.iota {dimensions = array<i32: 1>} : vector<8x128xi32>
    %2 = vector.broadcast %0 : vector<8x1xi32> to vector<8x128xi32>
    %3 = arith.cmpi eq, %2, %1 : vector<8x128xi32>
    %4 = arith.extui %3 : vector<8x128xi1> to vector<8x128xi32>
    %5 = arith.sitofp %4 : vector<8x128xi32> to vector<8x128xf32>
    %6 = arith.truncf %5 : vector<8x128xf32> to vector<8x128xbf16>
    %c0_1 = arith.constant 0 : index
    %c0_2 = arith.constant 0 : index
    %7 = vector.load %arg3[%c0_1, %c0_2] : memref<128x512xbf16, #tpu.memory_space<vmem>>, vector<128x512xbf16>
    %cst = arith.constant dense<0.000000e+00> : vector<8x512xf32>
    %8 = tpu.matmul %6, %7, %cst {dimension_numbers = #tpu.dot_dimension_numbers<[1], [0], [0], [1], [0, 0, 1, 1], [], []>} : vector<8x128xbf16>, vector<128x512xbf16>, vector<8x512xf32> -> vector<8x512xf32>
    %c0_3 = arith.constant 0 : index
    %c0_4 = arith.constant 0 : index
    %9 = vector.load %arg4[%c0_3, %c0_4] : memref<128x512xbf16, #tpu.memory_space<vmem>>, vector<128x512xbf16>
    %cst_5 = arith.constant dense<0.000000e+00> : vector<8x512xf32>
    %10 = tpu.matmul %6, %9, %cst_5 {dimension_numbers = #tpu.dot_dimension_numbers<[1], [0], [0], [1], [0, 0, 1, 1], [], []>} : vector<8x128xbf16>, vector<128x512xbf16>, vector<8x512xf32> -> vector<8x512xf32>
    %11 = arith.addf %8, %10 : vector<8x512xf32>
    %c0_6 = arith.constant 0 : index
    %c0_7 = arith.constant 0 : index
    %12 = vector.load %arg1[%c0_6, %c0_7] : memref<8x256xf32, #tpu.memory_space<vmem>>, vector<8x256xf32>
    %13 = arith.truncf %12 : vector<8x256xf32> to vector<8x256xbf16>
    %c0_8 = arith.constant 0 : index
    %c0_9 = arith.constant 0 : index
    %14 = vector.load %arg5[%c0_8, %c0_9] : memref<256x512xbf16, #tpu.memory_space<vmem>>, vector<256x512xbf16>
    %cst_10 = arith.constant dense<0.000000e+00> : vector<8x512xf32>
    %15 = tpu.matmul %13, %14, %cst_10 {dimension_numbers = #tpu.dot_dimension_numbers<[1], [0], [0], [1], [0, 0, 1, 1], [], []>} : vector<8x256xbf16>, vector<256x512xbf16>, vector<8x512xf32> -> vector<8x512xf32>
    %16 = arith.addf %15, %11 : vector<8x512xf32>
    %cst_11 = arith.constant 0.000000e+00 : f32
    %17 = vector.broadcast %cst_11 : f32 to vector<8x512xf32>
    %18 = arith.cmpf ogt, %16, %17 : vector<8x512xf32>
    %cst_12 = arith.constant 2.000000e-01 : f32
    %19 = vector.broadcast %cst_12 : f32 to vector<8x512xf32>
    %20 = arith.mulf %19, %16 : vector<8x512xf32>
    %21 = arith.select %18, %16, %20 : vector<8x512xi1>, vector<8x512xf32>
    %22 = arith.truncf %21 : vector<8x512xf32> to vector<8x512xbf16>
    %c0_13 = arith.constant 0 : index
    %c0_14 = arith.constant 0 : index
    %23 = vector.load %arg6[%c0_13, %c0_14] : memref<512x512xbf16, #tpu.memory_space<vmem>>, vector<512x512xbf16>
    %cst_15 = arith.constant dense<0.000000e+00> : vector<8x512xf32>
    %24 = tpu.matmul %22, %23, %cst_15 {dimension_numbers = #tpu.dot_dimension_numbers<[1], [0], [0], [1], [0, 0, 1, 1], [], []>} : vector<8x512xbf16>, vector<512x512xbf16>, vector<8x512xf32> -> vector<8x512xf32>
    %c0_16 = arith.constant 0 : index
    %c0_17 = arith.constant 0 : index
    %25 = vector.load %arg9[%c0_16, %c0_17] : memref<2x512xf32, #tpu.memory_space<vmem>>, vector<1x512xf32>
    %26 = vector.broadcast %25 : vector<1x512xf32> to vector<8x512xf32>
    %27 = arith.addf %24, %26 : vector<8x512xf32>
    %cst_18 = arith.constant 0.000000e+00 : f32
    %28 = vector.broadcast %cst_18 : f32 to vector<8x512xf32>
    %29 = arith.cmpf ogt, %27, %28 : vector<8x512xf32>
    %cst_19 = arith.constant 2.000000e-01 : f32
    %30 = vector.broadcast %cst_19 : f32 to vector<8x512xf32>
    %31 = arith.mulf %30, %27 : vector<8x512xf32>
    %32 = arith.select %29, %27, %31 : vector<8x512xi1>, vector<8x512xf32>
    %33 = arith.truncf %32 : vector<8x512xf32> to vector<8x512xbf16>
    %c0_20 = arith.constant 0 : index
    %c0_21 = arith.constant 0 : index
    %34 = vector.load %arg7[%c0_20, %c0_21] : memref<512x512xbf16, #tpu.memory_space<vmem>>, vector<512x512xbf16>
    %cst_22 = arith.constant dense<0.000000e+00> : vector<8x512xf32>
    %35 = tpu.matmul %33, %34, %cst_22 {dimension_numbers = #tpu.dot_dimension_numbers<[1], [0], [0], [1], [0, 0, 1, 1], [], []>} : vector<8x512xbf16>, vector<512x512xbf16>, vector<8x512xf32> -> vector<8x512xf32>
    %c1 = arith.constant 1 : index
    %c0_23 = arith.constant 0 : index
    %36 = vector.load %arg9[%c1, %c0_23] : memref<2x512xf32, #tpu.memory_space<vmem>>, vector<1x512xf32>
    %37 = vector.broadcast %36 : vector<1x512xf32> to vector<8x512xf32>
    %38 = arith.addf %35, %37 : vector<8x512xf32>
    %cst_24 = arith.constant 0.000000e+00 : f32
    %39 = vector.broadcast %cst_24 : f32 to vector<8x512xf32>
    %40 = arith.cmpf ogt, %38, %39 : vector<8x512xf32>
    %cst_25 = arith.constant 2.000000e-01 : f32
    %41 = vector.broadcast %cst_25 : f32 to vector<8x512xf32>
    %42 = arith.mulf %41, %38 : vector<8x512xf32>
    %43 = arith.select %40, %38, %42 : vector<8x512xi1>, vector<8x512xf32>
    %c0_26 = arith.constant 0 : index
    %c0_27 = arith.constant 0 : index
    %44 = vector.load %arg8[%c0_26, %c0_27] : memref<1x512xf32, #tpu.memory_space<vmem>>, vector<1x512xf32>
    %45 = vector.broadcast %44 : vector<1x512xf32> to vector<8x512xf32>
    %46 = arith.mulf %43, %45 : vector<8x512xf32>
    %cst_28 = arith.constant dense<0.000000e+00> : vector<8xf32>
    %47 = vector.multi_reduction <add>, %46, %cst_28 [1] : vector<8x512xf32> to vector<8xf32>
    %48 = vector.shape_cast %47 : vector<8xf32> to vector<8x1xf32>
    %c0_29 = arith.constant 0 : index
    %c0_30 = arith.constant 0 : index
    %49 = memref.load %arg10[%c0_29, %c0_30] : memref<1x1xf32, #tpu.memory_space<smem>>
    %50 = vector.broadcast %49 : f32 to vector<8x1xf32>
    %51 = arith.addf %48, %50 : vector<8x1xf32>
    %52 = vector.shape_cast %51 : vector<8x1xf32> to vector<8x1xf32>
    %53 = vector.broadcast %52 : vector<8x1xf32> to vector<8x128xf32>
    %54 = arith.truncf %53 : vector<8x128xf32> to vector<8x128xbf16>
    %c0_31 = arith.constant 0 : index
    %c0_32 = arith.constant 0 : index
    %55 = vector.load %arg11[%c0_31, %c0_32] : memref<8x128xbf16, #tpu.memory_space<vmem>>, vector<8x128xbf16>
    tpu.vector_store %arg11[%c0_31, %c0_32], %54 {strides = array<i32>} : memref<8x128xbf16, #tpu.memory_space<vmem>>, vector<8x128xbf16>,
    return
  }
  func.func @transform_0(%arg0: i32) -> (i32, i32) {
    %c0_i32 = arith.constant 0 : i32
    %c0_i32_0 = arith.constant 0 : i32
    return %arg0, %c0_i32 : i32, i32
  }
  func.func @transform_1(%arg0: i32) -> (i32, i32) {
    %c0_i32 = arith.constant 0 : i32
    %c0_i32_0 = arith.constant 0 : i32
    return %arg0, %c0_i32 : i32, i32
  }
  func.func @transform_2(%arg0: i32) -> (i32, i32) {
    %c0_i32 = arith.constant 0 : i32
    %c0_i32_0 = arith.constant 0 : i32
    %c0_i32_1 = arith.constant 0 : i32
    return %c0_i32, %c0_i32_0 : i32, i32
  }
  func.func @transform_3(%arg0: i32) -> (i32, i32) {
    %c0_i32 = arith.constant 0 : i32
    %c0_i32_0 = arith.constant 0 : i32
    %c0_i32_1 = arith.constant 0 : i32
    return %c0_i32, %c0_i32_0 : i32, i32
  }
  func.func @transform_4(%arg0: i32) -> (i32, i32) {
    %c0_i32 = arith.constant 0 : i32
    %c0_i32_0 = arith.constant 0 : i32
    %c0_i32_1 = arith.constant 0 : i32
    return %c0_i32, %c0_i32_0 : i32, i32
  }
  func.func @transform_5(%arg0: i32) -> (i32, i32) {
    %c0_i32 = arith.constant 0 : i32
    %c0_i32_0 = arith.constant 0 : i32
    %c0_i32_1 = arith.constant 0 : i32
    return %c0_i32, %c0_i32_0 : i32, i32
  }
  func.func @transform_6(%arg0: i32) -> (i32, i32) {
    %c0_i32 = arith.constant 0 : i32
    %c0_i32_0 = arith.constant 0 : i32
    %c0_i32_1 = arith.constant 0 : i32
    return %c0_i32, %c0_i32_0 : i32, i32
  }
  func.func @transform_7(%arg0: i32) -> (i32, i32) {
    %c0_i32 = arith.constant 0 : i32
    %c0_i32_0 = arith.constant 0 : i32
    %c0_i32_1 = arith.constant 0 : i32
    return %c0_i32, %c0_i32_0 : i32, i32
  }
  func.func @transform_8(%arg0: i32) -> (i32, i32) {
    %c0_i32 = arith.constant 0 : i32
    %c0_i32_0 = arith.constant 0 : i32
    %c0_i32_1 = arith.constant 0 : i32
    return %c0_i32, %c0_i32_0 : i32, i32
  }
  func.func @transform_9(%arg0: i32) -> (i32, i32) {
    %c0_i32 = arith.constant 0 : i32
    %c0_i32_0 = arith.constant 0 : i32
    %c0_i32_1 = arith.constant 0 : i32
    return %c0_i32, %c0_i32_0 : i32, i32
  }
  func.func @transform_10(%arg0: i32) -> (i32, i32) {
    %c0_i32 = arith.constant 0 : i32
    %c0_i32_0 = arith.constant 0 : i32
    return %arg0, %c0_i32 : i32, i32
  }
}

</mosaic_0001>

<bundles_post_ra>
// kernel: tpu_custom_call.1
= control target key start
LH: loop header
LB: loop body
LE: loop exit
PB: predicated region body
PF: predicated region fallthrough
CT: control target
= control target key end

     0   :  { %16 = vsyncpa [#allocation4], 0  ;;  %s4582_s0 = inlined_call_operand.hbm [shape: f32[8,256], index: 0, kind: input, shape index: {}]   ;;  %s4583_s1 = inlined_call_operand.vmem [shape: s32[8,1], index: 1, kind: input, shape index: {}]   ;;  %s4584_s2 = inlined_call_operand.hbm [shape: bf16[128,512], index: 2, kind: input, shape index: {}]   ;;  %s4585_s3 = inlined_call_operand.hbm [shape: bf16[128,512], index: 3, kind: input, shape index: {}]   ;;  %s4586_s4 = inlined_call_operand.hbm [shape: bf16[256,512], index: 4, kind: input, shape index: {}]   ;;  %s4587_s5 = inlined_call_operand.hbm [shape: bf16[512,512], index: 5, kind: input, shape index: {}]   ;;  %s4588_s6 = inlined_call_operand.hbm [shape: bf16[512,512], index: 6, kind: input, shape index: {}]   ;;  %s4589_s7 = inlined_call_operand.vmem [shape: f32[1,512], index: 7, kind: input, shape index: {}]   ;;  %s4590_s8 = inlined_call_operand.vmem [shape: f32[2,512], index: 8, kind: input, shape index: {}]   ;;  %s4591_s9 = inlined_call_operand.<no memory space> [shape: f32[1,1], index: 9, kind: input, shape index: {}]   ;;  %s4592_s10 = inlined_call_operand.hbm [shape: bf16[8,128], index: 10, kind: output, shape index: {}]  }
   0x1   :  { %17 = vsyncpa [#allocation7], 0 }
   0x2   :  { %18 = vsyncpa [#allocation10], 0 }
   0x3   :  { %19 = vsyncpa [#allocation13], 0 }
   0x4   :  { %20 = vsyncpa [#allocation5], 0  ;;  %s4339_s13 = smov [#allocation6]   ;;  %s4175_s17 = scalar_lea.hbm %s4584_s2, 4096 }
   0x5   :  { %s38_s14 = sshll.u32 %s4339_s13, 4  ;;  %p4176_p0 = scmp.ne.s32.totalorder %s4584_s2, %s4175_s17  ;;  %s39_s14 = int_to_ptr.vmem [resolvable:$true] %s38_s14 }
   0x6   :  { %p4179_p1 = scmp.lt.u32.totalorder %s4175_s17, %s4584_s2 }
   0x8   :  { %p4181_p2 = pnand %p4179_p1, %p4176_p0 }
   0xa   :  { %4184 = shalt.err (!%p4181_p2)
}
   0xb   :  { %s4185_s22 = scalar_lea.vmem %s39_s14, 4096  ;;  %p4190_p4 = scmp.lt.s32.totalorder %s39_s14, %s39_s14 }
   0xc   :  { %p4186_p3 = scmp.ne.s32.totalorder %s39_s14, %s4185_s22  ;;  %p4191_p5 = scmp.lt.s32.totalorder %s4185_s22, %s4185_s22 }
   0xe   :  { %p4192_p6 = por %p4191_p5, %p4190_p4 }
  0x10   :  { %p4193_p7 = pnand %p4192_p6, %p4186_p3 }
  0x12   :  { %4196 = shalt.err (!%p4193_p7)
}
  0x13   :  { %s4340_s23 = smov 256   ;;  %s4341_s24 = smov 16  }
  0x14   :  { %44 = dma.hbm_to_vmem [thread:$0]  %s4584_s2, 4096, %s39_s14, [#allocation7], %s4340_s23, %s4340_s23, %s4341_s24  }
  0x15   :  { %s4342_s27 = smov [#allocation9]   ;;  %s4343_s29 = smov [#allocation3]  }
  0x16   :  { %s62_s28 = sshll.u32 %s4342_s27, 4  ;;  %s27_s30 = sshll.u32 %s4343_s29, 4  ;;  %s63_s28 = int_to_ptr.vmem [resolvable:$true] %s62_s28  ;;  %s28_s30 = int_to_ptr.vmem [resolvable:$true] %s27_s30 }
  0x17   :  { %s4197_s13 = scalar_lea.hbm %s4586_s4, 8192 }
  0x18   :  { %p4198_p8 = scmp.ne.s32.totalorder %s4586_s4, %s4197_s13  ;;  %p4201_p9 = scmp.lt.u32.totalorder %s4197_s13, %s4586_s4 }
  0x1a   :  { %p4203_p10 = pnand %p4201_p9, %p4198_p8 }
  0x1c   :  { %4206 = shalt.err (!%p4203_p10)
}
  0x1d   :  { %s4207_s2 = scalar_lea.vmem %s63_s28, 8192  ;;  %p4212_p12 = scmp.lt.s32.totalorder %s63_s28, %s63_s28 }
  0x1e   :  { %p4208_p11 = scmp.ne.s32.totalorder %s63_s28, %s4207_s2  ;;  %p4213_p13 = scmp.lt.s32.totalorder %s4207_s2, %s4207_s2 }
  0x20   :  { %p4214_p0 = por %p4213_p13, %p4212_p12 }
  0x22   :  { %p4215_p1 = pnand %p4214_p0, %p4208_p11 }
  0x24   :  { %4218 = shalt.err (!%p4215_p1)
}
  0x25   :  { %68 = dma.hbm_to_vmem [thread:$0]  %s4586_s4, 8192, %s63_s28, [#allocation10], %s4340_s23, %s4340_s23, %s4341_s24  }
  0x26   :  { %s4219_s22 = scalar_lea.hbm %s4582_s0, 256 }
  0x27   :  { %p4220_p2 = scmp.ne.s32.totalorder %s4582_s0, %s4219_s22  ;;  %p4223_p3 = scmp.lt.u32.totalorder %s4219_s22, %s4582_s0 }
  0x29   :  { %p4225_p4 = pnand %p4223_p3, %p4220_p2 }
  0x2b   :  { %4228 = shalt.err (!%p4225_p4)
}
  0x2c   :  { %s4229_s11 = scalar_lea.vmem %s28_s30, 256  ;;  %p4234_p6 = scmp.lt.s32.totalorder %s28_s30, %s28_s30 }
  0x2d   :  { %p4230_p5 = scmp.ne.s32.totalorder %s28_s30, %s4229_s11  ;;  %p4235_p7 = scmp.lt.s32.totalorder %s4229_s11, %s4229_s11 }
  0x2f   :  { %p4236_p8 = por %p4235_p7, %p4234_p6 }
  0x31   :  { %p4237_p9 = pnand %p4236_p8, %p4230_p5 }
  0x33   :  { %4240 = shalt.err (!%p4237_p9)
}
  0x34   :  { %30 = dma.hbm_to_vmem [thread:$0]  %s4582_s0, 256, %s28_s30, [#allocation4]  }
  0x35   :  { %s4344_s12 = smov [#allocation8]   ;;  %s4345_s15 = smov [#allocation11]  }
  0x36   :  { %s50_s13 = sshll.u32 %s4344_s12, 4  ;;  %s74_s16 = sshll.u32 %s4345_s15, 4  ;;  %s51_s13 = int_to_ptr.vmem [resolvable:$true] %s50_s13  ;;  %s75_s16 = int_to_ptr.vmem [resolvable:$true] %s74_s16 }
  0x37   :  { %s4241_s2 = scalar_lea.hbm %s4585_s3, 4096 }
  0x38   :  { %p4242_p10 = scmp.ne.s32.totalorder %s4585_s3, %s4241_s2  ;;  %p4245_p11 = scmp.lt.u32.totalorder %s4241_s2, %s4585_s3 }
  0x3a   :  { %p4247_p12 = pnand %p4245_p11, %p4242_p10 }
  0x3c   :  { %4250 = shalt.err (!%p4247_p12)
}
  0x3d   :  { %s4251_s0 = scalar_lea.vmem %s51_s13, 4096  ;;  %p4256_p0 = scmp.lt.s32.totalorder %s51_s13, %s51_s13 }
  0x3e   :  { %p4252_p13 = scmp.ne.s32.totalorder %s51_s13, %s4251_s0  ;;  %p4257_p1 = scmp.lt.s32.totalorder %s4251_s0, %s4251_s0 }
  0x40   :  { %p4258_p2 = por %p4257_p1, %p4256_p0 }
  0x42   :  { %p4259_p3 = pnand %p4258_p2, %p4252_p13 }
  0x44   :  { %4262 = shalt.err (!%p4259_p3)
}
  0x45   :  { %56 = dma.hbm_to_vmem [thread:$0]  %s4585_s3, 4096, %s51_s13, [#allocation7], %s4340_s23, %s4340_s23, %s4341_s24  }
  0x46   :  { %s4263_s27 = scalar_lea.hbm %s4587_s5, 16384 }
  0x47   :  { %p4264_p4 = scmp.ne.s32.totalorder %s4587_s5, %s4263_s27  ;;  %p4267_p5 = scmp.lt.u32.totalorder %s4263_s27, %s4587_s5 }
  0x49   :  { %p4269_p6 = pnand %p4267_p5, %p4264_p4 }
  0x4b   :  { %4272 = shalt.err (!%p4269_p6)
}
  0x4c   :  { %s4273_s12 = scalar_lea.vmem %s75_s16, 16384  ;;  %p4278_p8 = scmp.lt.s32.totalorder %s75_s16, %s75_s16 }
  0x4d   :  { %p4274_p7 = scmp.ne.s32.totalorder %s75_s16, %s4273_s12  ;;  %p4279_p9 = scmp.lt.s32.totalorder %s4273_s12, %s4273_s12 }
  0x4f   :  { %p4280_p10 = por %p4279_p9, %p4278_p8 }
  0x51   :  { %p4281_p11 = pnand %p4280_p10, %p4274_p7 }
  0x53   :  { %4284 = shalt.err (!%p4281_p11)
}
  0x54   :  { %80 = dma.hbm_to_vmem [thread:$0]  %s4587_s5, 16384, %s75_s16, [#allocation10], %s4340_s23, %s4340_s23, %s4341_s24  }
  0x55   :  { %s4346_s15 = smov [#allocation12]   ;;  %s4285_s14 = scalar_lea.hbm %s4588_s6, 16384 }
  0x56   :  { %s86_s17 = sshll.u32 %s4346_s15, 4  ;;  %p4286_p12 = scmp.ne.s32.totalorder %s4588_s6, %s4285_s14  ;;  %s87_s17 = int_to_ptr.vmem [resolvable:$true] %s86_s17 }
  0x57   :  { %p4289_p13 = scmp.lt.u32.totalorder %s4285_s14, %s4588_s6 }
  0x59   :  { %p4291_p0 = pnand %p4289_p13, %p4286_p12 }
  0x5b   :  { %4294 = shalt.err (!%p4291_p0)
}
  0x5c   :  { %s4295_s30 = scalar_lea.vmem %s87_s17, 16384  ;;  %p4300_p2 = scmp.lt.s32.totalorder %s87_s17, %s87_s17 }
  0x5d   :  { %p4296_p1 = scmp.ne.s32.totalorder %s87_s17, %s4295_s30  ;;  %p4301_p3 = scmp.lt.s32.totalorder %s4295_s30, %s4295_s30 }
  0x5f   :  { %p4302_p4 = por %p4301_p3, %p4300_p2 }
  0x61   :  { %p4303_p5 = pnand %p4302_p4, %p4296_p1 }
  0x63   :  { %4306 = shalt.err (!%p4303_p5)
}
  0x64   :  { %92 = dma.hbm_to_vmem [thread:$0]  %s4588_s6, 16384, %s87_s17, [#allocation13], %s4340_s23, %s4340_s23, %s4341_s24  }
  0x65   :  { %4329 = dma.done.wait [#allocation4], 256  }
  0x66   :  { %4330 = vsyncadd [#allocation4], 4294967040 }
  0x67   :  { %4331 = dma.done.wait [#allocation7], 8192  }
  0x68   :  { %4332 = vsyncadd [#allocation7], 4294959104 }
  0x69   :  { %4333 = dma.done.wait [#allocation10], 24576  }
  0x6a   :  { %4334 = vsyncadd [#allocation10], 4294942720 }
  0x6b   :  { %4335 = dma.done.wait [#allocation13], 16384  }
  0x6c   :  { %4336 = vsyncadd [#allocation13], 4294950912  ;;  %v4347_v0 = vmov 0   ;;  %v118_v1 = vld [vmem:[%s4583_s1] sm:$0xff]  ;;  %v3601_v3 = vld [vmem:[#allocation8 + $0xc] ss:$16 sps:$4 sm:$0xff]   ;;  %v119_v36 = vlaneseq }
  0x6d   :  { %3598 = vset.pattern.permute.xlu0 %v4347_v0  ;;  %384 = vmatprep.mubr.bf16.mxu0 %v4347_v0  ;;  %v3599_v2 = vld [vmem:[#allocation8 + $0x4] ss:$16 sps:$4 sm:$0xff]   ;;  %v3603_v4 = vld [vmem:[#allocation8] ss:$16 sps:$4 sm:$0xff]   ;;  %v3604_v5 = vld [vmem:[#allocation8 + $0x8] ss:$16 sps:$4 sm:$0xff]  }
  0x6e   :  { %425 = vmatprep.mubr.bf16.mxu1 %v4347_v0  ;;  %122 = vperm.xlu0 %3598, %v118_v1   ;;  %v3605_v6 = vld [vmem:[#allocation8 + $0x24] ss:$16 sps:$4 sm:$0xff]   ;;  %v3607_v7 = vld [vmem:[#allocation8 + $0x2c] ss:$16 sps:$4 sm:$0xff]   ;;  %v3609_v8 = vld [vmem:[#allocation8 + $0x20] ss:$16 sps:$4 sm:$0xff]  }
  0x6f   :  { %352 = vmatprep.subr.bf16.mxu0 %v3599_v2  ;;  %393 = vmatprep.subr.bf16.mxu1 %v3601_v3  ;;  %v3610_v9 = vld [vmem:[#allocation8 + $0x28] ss:$16 sps:$4 sm:$0xff]   ;;  %v3611_v10 = vld [vmem:[#allocation8 + $0x44] ss:$16 sps:$4 sm:$0xff]   ;;  %v3613_v11 = vld [vmem:[#allocation8 + $0x4c] ss:$16 sps:$4 sm:$0xff]  }
  0x70   :  { %353 = vmatpush1.bf16.msra.mxu0 %v3603_v4  ;;  %394 = vmatpush1.bf16.msra.mxu1 %v3604_v5  ;;  %v3615_v12 = vld [vmem:[#allocation8 + $0x40] ss:$16 sps:$4 sm:$0xff]   ;;  %v3616_v13 = vld [vmem:[#allocation8 + $0x48] ss:$16 sps:$4 sm:$0xff]   ;;  %v3617_v14 = vld [vmem:[#allocation8 + $0x64] ss:$16 sps:$4 sm:$0xff]  }
  0x71   :  { %354 = vmatprep.subr.bf16.mxu0 %v3605_v6  ;;  %395 = vmatprep.subr.bf16.mxu1 %v3607_v7  ;;  %v3619_v15 = vld [vmem:[#allocation8 + $0x6c] ss:$16 sps:$4 sm:$0xff]   ;;  %v3621_v16 = vld [vmem:[#allocation8 + $0x60] ss:$16 sps:$4 sm:$0xff]   ;;  %v3622_v17 = vld [vmem:[#allocation8 + $0x68] ss:$16 sps:$4 sm:$0xff]  }
  0x72   :  { %v3623_v18 = vld [vmem:[#allocation8 + $0x84] ss:$16 sps:$4 sm:$0xff]   ;;  %v3625_v19 = vld [vmem:[#allocation8 + $0x8c] ss:$16 sps:$4 sm:$0xff]   ;;  %v3627_v20 = vld [vmem:[#allocation8 + $0x80] ss:$16 sps:$4 sm:$0xff]  }
  0x73   :  { %v3628_v21 = vld [vmem:[#allocation8 + $0x88] ss:$16 sps:$4 sm:$0xff]   ;;  %v3629_v22 = vld [vmem:[#allocation8 + $0xa4] ss:$16 sps:$4 sm:$0xff]   ;;  %v3631_v23 = vld [vmem:[#allocation8 + $0xac] ss:$16 sps:$4 sm:$0xff]  }
  0x74   :  { %355 = vmatpush1.bf16.msra.mxu0 %v3609_v8  ;;  %396 = vmatpush1.bf16.msra.mxu1 %v3610_v9  ;;  %v3633_v24 = vld [vmem:[#allocation8 + $0xa0] ss:$16 sps:$4 sm:$0xff]   ;;  %v3634_v25 = vld [vmem:[#allocation8 + $0xa8] ss:$16 sps:$4 sm:$0xff]   ;;  %v3635_v26 = vld [vmem:[#allocation8 + $0xc4] ss:$16 sps:$4 sm:$0xff]  }
  0x75   :  { %356 = vmatprep.subr.bf16.mxu0 %v3611_v10  ;;  %397 = vmatprep.subr.bf16.mxu1 %v3613_v11  ;;  %v3637_v27 = vld [vmem:[#allocation8 + $0xcc] ss:$16 sps:$4 sm:$0xff]   ;;  %v3639_v28 = vld [vmem:[#allocation8 + $0xc0] ss:$16 sps:$4 sm:$0xff]   ;;  %v3640_v29 = vld [vmem:[#allocation8 + $0xc8] ss:$16 sps:$4 sm:$0xff]  }
  0x76   :  { %v3641_v30 = vld [vmem:[#allocation8 + $0xe4] ss:$16 sps:$4 sm:$0xff]   ;;  %v3643_v31 = vld [vmem:[#allocation8 + $0xec] ss:$16 sps:$4 sm:$0xff]   ;;  %v3645_v32 = vld [vmem:[#allocation8 + $0xe0] ss:$16 sps:$4 sm:$0xff]  }
  0x77   :  { %v3646_v33 = vld [vmem:[#allocation8 + $0xe8] ss:$16 sps:$4 sm:$0xff]   ;;  %v3649_v34 = vld [vmem:[#allocation6 + $0x4] ss:$16 sps:$4 sm:$0xff]   ;;  %v3652_v35 = vld [vmem:[#allocation6 + $0xc] ss:$16 sps:$4 sm:$0xff]  }
  0x78   :  { %357 = vmatpush1.bf16.msra.mxu0 %v3615_v12  ;;  %398 = vmatpush1.bf16.msra.mxu1 %v3616_v13  ;;  %v120_v37 = vand.u32 127, %v119_v36  ;;  %v3647_v39 = vld [vmem:[#allocation6] ss:$16 sps:$4 sm:$0xff]   ;;  %v3650_v40 = vld [vmem:[#allocation6 + $0x8] ss:$16 sps:$4 sm:$0xff]   ;;  %s4349_s29 = smov [#allocation14]  }
  0x79   :  { %358 = vmatprep.subr.bf16.mxu0 %v3617_v14  ;;  %399 = vmatprep.subr.bf16.mxu1 %v3619_v15  ;;  %v3655_v41 = vld [vmem:[#allocation6 + $0x24] ss:$16 sps:$4 sm:$0xff]   ;;  %v3658_v42 = vld [vmem:[#allocation6 + $0x2c] ss:$16 sps:$4 sm:$0xff]   ;;  %v4348_v44 = vmov 1.0|1.0  }
  0x7a   :  { %v3653_v45 = vld [vmem:[#allocation6 + $0x20] ss:$16 sps:$4 sm:$0xff]   ;;  %v3656_v46 = vld [vmem:[#allocation6 + $0x28] ss:$16 sps:$4 sm:$0xff]   ;;  %v3661_v47 = vld [vmem:[#allocation6 + $0x44] ss:$16 sps:$4 sm:$0xff]  }
  0x7b   :  { %v3664_v48 = vld [vmem:[#allocation6 + $0x4c] ss:$16 sps:$4 sm:$0xff]   ;;  %v3659_v49 = vld [vmem:[#allocation6 + $0x40] ss:$16 sps:$4 sm:$0xff]   ;;  %v3662_v50 = vld [vmem:[#allocation6 + $0x48] ss:$16 sps:$4 sm:$0xff]  }
  0x7c   :  { %359 = vmatpush1.bf16.msra.mxu0 %v3621_v16  ;;  %400 = vmatpush1.bf16.msra.mxu1 %v3622_v17  ;;  %v3667_v51 = vld [vmem:[#allocation6 + $0x64] ss:$16 sps:$4 sm:$0xff]   ;;  %v3670_v52 = vld [vmem:[#allocation6 + $0x6c] ss:$16 sps:$4 sm:$0xff]   ;;  %v3665_v53 = vld [vmem:[#allocation6 + $0x60] ss:$16 sps:$4 sm:$0xff]  }
  0x7d   :  { %360 = vmatprep.subr.bf16.mxu0 %v3623_v18  ;;  %401 = vmatprep.subr.bf16.mxu1 %v3625_v19  ;;  %v3668_v54 = vld [vmem:[#allocation6 + $0x68] ss:$16 sps:$4 sm:$0xff]   ;;  %v3673_v55 = vld [vmem:[#allocation6 + $0x84] ss:$16 sps:$4 sm:$0xff]   ;;  %v3676_v56 = vld [vmem:[#allocation6 + $0x8c] ss:$16 sps:$4 sm:$0xff]  }
  0x7e   :  { %v3671_v57 = vld [vmem:[#allocation6 + $0x80] ss:$16 sps:$4 sm:$0xff]   ;;  %v3674_v58 = vld [vmem:[#allocation6 + $0x88] ss:$16 sps:$4 sm:$0xff]   ;;  %v3679_v59 = vld [vmem:[#allocation6 + $0xa4] ss:$16 sps:$4 sm:$0xff]  }
  0x7f   :  { %v3682_v60 = vld [vmem:[#allocation6 + $0xac] ss:$16 sps:$4 sm:$0xff]   ;;  %v3677_v61 = vld [vmem:[#allocation6 + $0xa0] ss:$16 sps:$4 sm:$0xff]   ;;  %v3680_v62 = vld [vmem:[#allocation6 + $0xa8] ss:$16 sps:$4 sm:$0xff]  }
  0x80   :  { %361 = vmatpush1.bf16.msra.mxu0 %v3627_v20  ;;  %402 = vmatpush1.bf16.msra.mxu1 %v3628_v21  ;;  %v3685_v63 = vld [vmem:[#allocation6 + $0xc4] ss:$16 sps:$4 sm:$0xff]   ;;  %v3683_v1 = vld [vmem:[#allocation6 + $0xc0] ss:$16 sps:$4 sm:$0xff]   ;;  %v3686_v2 = vld [vmem:[#allocation6 + $0xc8] ss:$16 sps:$4 sm:$0xff]  }
  0x81   :  { %362 = vmatprep.subr.bf16.mxu0 %v3629_v22  ;;  %403 = vmatprep.subr.bf16.mxu1 %v3631_v23  ;;  %v3691_v3 = vld [vmem:[#allocation6 + $0xe4] ss:$16 sps:$4 sm:$0xff]   ;;  %v3694_v4 = vld [vmem:[#allocation6 + $0xec] ss:$16 sps:$4 sm:$0xff]   ;;  %v3689_v5 = vld [vmem:[#allocation6 + $0xe0] ss:$16 sps:$4 sm:$0xff]  }
  0x82   :  { %v3692_v6 = vld [vmem:[#allocation6 + $0xe8] ss:$16 sps:$4 sm:$0xff]   ;;  %v3697_v7 = vld [vmem:[#allocation9 + $0x4] ss:$16 sps:$4 sm:$0xff]   ;;  %v3700_v8 = vld [vmem:[#allocation9 + $0xc] ss:$16 sps:$4 sm:$0xff]  }
  0x83   :  { %v677_v9 = vld [vmem:[#allocation3 + $0x8] sm:$0xff]  ;;  %v3695_v10 = vld [vmem:[#allocation9] ss:$16 sps:$4 sm:$0xff]   ;;  %v3703_v12 = vld [vmem:[#allocation9 + $0x24] ss:$16 sps:$4 sm:$0xff]   ;;  %s3141_s11 = sshll.u32 %s4349_s29, 4  ;;  %s3142_s11 = int_to_ptr.vmem [resolvable:$true] %s3141_s11 }
  0x84   :  { %363 = vmatpush1.bf16.msra.mxu0 %v3633_v24  ;;  %404 = vmatpush1.bf16.msra.mxu1 %v3634_v25  ;;  %v3698_v11 = vld [vmem:[#allocation9 + $0x8] ss:$16 sps:$4 sm:$0xff]   ;;  %v3706_v13 = vld [vmem:[#allocation9 + $0x2c] ss:$16 sps:$4 sm:$0xff]   ;;  %v3701_v14 = vld [vmem:[#allocation9 + $0x20] ss:$16 sps:$4 sm:$0xff]   ;;  %v679_v16 = vpack.c.bf16 %v677_v9, %v677_v9  ;;  %p4312_p7 = scmp.lt.s32.totalorder %s3142_s11, %s3142_s11 }
  0x85   :  { %364 = vmatprep.subr.bf16.mxu0 %v3635_v26  ;;  %405 = vmatprep.subr.bf16.mxu1 %v3637_v27  ;;  %v3704_v15 = vld [vmem:[#allocation9 + $0x28] ss:$16 sps:$4 sm:$0xff]   ;;  %v3709_v17 = vld [vmem:[#allocation9 + $0x44] ss:$16 sps:$4 sm:$0xff]   ;;  %v3712_v18 = vld [vmem:[#allocation9 + $0x4c] ss:$16 sps:$4 sm:$0xff]  }
  0x86   :  { %v3707_v19 = vld [vmem:[#allocation9 + $0x40] ss:$16 sps:$4 sm:$0xff]   ;;  %v3710_v20 = vld [vmem:[#allocation9 + $0x48] ss:$16 sps:$4 sm:$0xff]   ;;  %v3715_v21 = vld [vmem:[#allocation9 + $0x64] ss:$16 sps:$4 sm:$0xff]  }
  0x87   :  { %v3718_v22 = vld [vmem:[#allocation9 + $0x6c] ss:$16 sps:$4 sm:$0xff]   ;;  %v3713_v23 = vld [vmem:[#allocation9 + $0x60] ss:$16 sps:$4 sm:$0xff]   ;;  %v3716_v24 = vld [vmem:[#allocation9 + $0x68] ss:$16 sps:$4 sm:$0xff]  }
  0x88   :  { %365 = vmatpush1.bf16.msra.mxu0 %v3639_v28  ;;  %406 = vmatpush1.bf16.msra.mxu1 %v3640_v29  ;;  %v3721_v25 = vld [vmem:[#allocation9 + $0x84] ss:$16 sps:$4 sm:$0xff]   ;;  %v3724_v26 = vld [vmem:[#allocation9 + $0x8c] ss:$16 sps:$4 sm:$0xff]   ;;  %v3719_v27 = vld [vmem:[#allocation9 + $0x80] ss:$16 sps:$4 sm:$0xff]  }
  0x89   :  { %366 = vmatprep.subr.bf16.mxu0 %v3641_v30  ;;  %407 = vmatprep.subr.bf16.mxu1 %v3643_v31  ;;  %v3722_v28 = vld [vmem:[#allocation9 + $0x88] ss:$16 sps:$4 sm:$0xff]   ;;  %v3727_v29 = vld [vmem:[#allocation9 + $0xa4] ss:$16 sps:$4 sm:$0xff]   ;;  %v3730_v30 = vld [vmem:[#allocation9 + $0xac] ss:$16 sps:$4 sm:$0xff]  }
  0x8a   :  { %v3725_v31 = vld [vmem:[#allocation9 + $0xa0] ss:$16 sps:$4 sm:$0xff]   ;;  %v3748_v43 = vld [vmem:[#allocation9 + $0x10c] ss:$16 sps:$4 sm:$0xff]   ;;  %v3788_v9 = vld [vmem:[#allocation9 + $0x1e8] ss:$16 sps:$4 sm:$0xff]  }
  0x8b   :  { %s4307_s4 = scalar_lea.vmem %s3142_s11, 64 }
  0x8c   :  { %367 = vmatpush1.bf16.msra.mxu0 %v3645_v32  ;;  %408 = vmatpush1.bf16.msra.mxu1 %v3646_v33  ;;  %v3728_v32 = vld [vmem:[#allocation9 + $0xa8] ss:$16 sps:$4 sm:$0xff]   ;;  %v3733_v33 = vld [vmem:[#allocation9 + $0xc4] ss:$16 sps:$4 sm:$0xff]   ;;  %p4308_p6 = scmp.ne.s32.totalorder %s3142_s11, %s4307_s4  ;;  %p4313_p8 = scmp.lt.s32.totalorder %s4307_s4, %s4307_s4 }
  0x8d   :  { %594 = vmatprep.subr.bf16.mxu0 %v3649_v34  ;;  %635 = vmatprep.subr.bf16.mxu1 %v3652_v35  ;;  %v3736_v34 = vld [vmem:[#allocation9 + $0xcc] ss:$16 sps:$4 sm:$0xff]   ;;  %v3731_v35 = vld [vmem:[#allocation9 + $0xc0] ss:$16 sps:$4 sm:$0xff]  }
  0x8e   :  { %p4314_p9 = por %p4313_p8, %p4312_p7 }
  0x90   :  { %p4315_p10 = pnand %p4314_p9, %p4308_p6 }
  0xed   :  { %v123_v38 = vpop.permute.xlu0 %122 }
  0xee   :  { %vm124_vm0 = vcmp.eq.s32.totalorder %v123_v38, %v120_v37  ;;  %v3734_v37 = vld [vmem:[#allocation9 + $0xc8] ss:$16 sps:$4 sm:$0xff]   ;;  %v3739_v38 = vld [vmem:[#allocation9 + $0xe4] ss:$16 sps:$4 sm:$0xff]  }
  0xef   :  { %vm4499_vm1 = vmpackc.low %vm124_vm0, %vm124_vm0 }
  0xf0   :  { %3187 = vmatmul.mubr.msk.bf16.vlgmr.msra.gmra.mrb[0].mxu0 %vm4499_vm1, %v4348_v44  ;;  %3189 = vmatmul.mubr.msk.bf16.vlgmr.msra.gmra.mrb[0].mxu1 %vm4499_vm1, %v4348_v44 }
  0xf1   :  { %595 = vmatpush1.bf16.msra.mxu0 %v3647_v39  ;;  %636 = vmatpush1.bf16.msra.mxu1 %v3650_v40  ;;  %v3742_v39 = vld [vmem:[#allocation9 + $0xec] ss:$16 sps:$4 sm:$0xff]   ;;  %v3737_v40 = vld [vmem:[#allocation9 + $0xe0] ss:$16 sps:$4 sm:$0xff]  }
  0xf2   :  { %596 = vmatprep.subr.bf16.mxu0 %v3655_v41  ;;  %637 = vmatprep.subr.bf16.mxu1 %v3658_v42  ;;  %v3740_v41 = vld [vmem:[#allocation9 + $0xe8] ss:$16 sps:$4 sm:$0xff]   ;;  %v3745_v42 = vld [vmem:[#allocation9 + $0x104] ss:$16 sps:$4 sm:$0xff]  }
  0xf3   :  { %626 = vmatprep.mubr.bf16.mxu0 %v4347_v0  ;;  %667 = vmatprep.mubr.bf16.mxu1 %v4347_v0  ;;  %v3688_v0 = vld [vmem:[#allocation6 + $0xcc] ss:$16 sps:$4 sm:$0xff]  }
  0xf5   :  { %597 = vmatpush1.bf16.msra.mxu0 %v3653_v45  ;;  %638 = vmatpush1.bf16.msra.mxu1 %v3656_v46  ;;  %v3746_v45 = vld [vmem:[#allocation9 + $0x108] ss:$16 sps:$4 sm:$0xff]   ;;  %v3751_v46 = vld [vmem:[#allocation9 + $0x124] ss:$16 sps:$4 sm:$0xff]  }
  0xf6   :  { %598 = vmatprep.subr.bf16.mxu0 %v3661_v47  ;;  %639 = vmatprep.subr.bf16.mxu1 %v3664_v48  ;;  %v3754_v47 = vld [vmem:[#allocation9 + $0x12c] ss:$16 sps:$4 sm:$0xff]   ;;  %v3749_v48 = vld [vmem:[#allocation9 + $0x120] ss:$16 sps:$4 sm:$0xff]  }
  0xf9   :  { %599 = vmatpush1.bf16.msra.mxu0 %v3659_v49  ;;  %640 = vmatpush1.bf16.msra.mxu1 %v3662_v50  ;;  %v3752_v49 = vld [vmem:[#allocation9 + $0x128] ss:$16 sps:$4 sm:$0xff]   ;;  %v3757_v50 = vld [vmem:[#allocation9 + $0x144] ss:$16 sps:$4 sm:$0xff]  }
  0xfa   :  { %600 = vmatprep.subr.bf16.mxu0 %v3667_v51  ;;  %641 = vmatprep.subr.bf16.mxu1 %v3670_v52  ;;  %v3760_v51 = vld [vmem:[#allocation9 + $0x14c] ss:$16 sps:$4 sm:$0xff]   ;;  %v3755_v52 = vld [vmem:[#allocation9 + $0x140] ss:$16 sps:$4 sm:$0xff]  }
  0xfd   :  { %601 = vmatpush1.bf16.msra.mxu0 %v3665_v53  ;;  %642 = vmatpush1.bf16.msra.mxu1 %v3668_v54  ;;  %v3758_v53 = vld [vmem:[#allocation9 + $0x148] ss:$16 sps:$4 sm:$0xff]   ;;  %v3763_v54 = vld [vmem:[#allocation9 + $0x164] ss:$16 sps:$4 sm:$0xff]  }
  0xfe   :  { %602 = vmatprep.subr.bf16.mxu0 %v3673_v55  ;;  %643 = vmatprep.subr.bf16.mxu1 %v3676_v56  ;;  %v3766_v55 = vld [vmem:[#allocation9 + $0x16c] ss:$16 sps:$4 sm:$0xff]   ;;  %v3761_v56 = vld [vmem:[#allocation9 + $0x160] ss:$16 sps:$4 sm:$0xff]  }
 0x101   :  { %603 = vmatpush1.bf16.msra.mxu0 %v3671_v57  ;;  %644 = vmatpush1.bf16.msra.mxu1 %v3674_v58  ;;  %v3764_v57 = vld [vmem:[#allocation9 + $0x168] ss:$16 sps:$4 sm:$0xff]   ;;  %v3769_v58 = vld [vmem:[#allocation9 + $0x184] ss:$16 sps:$4 sm:$0xff]  }
 0x102   :  { %604 = vmatprep.subr.bf16.mxu0 %v3679_v59  ;;  %645 = vmatprep.subr.bf16.mxu1 %v3682_v60  ;;  %v3772_v59 = vld [vmem:[#allocation9 + $0x18c] ss:$16 sps:$4 sm:$0xff]   ;;  %v3767_v60 = vld [vmem:[#allocation9 + $0x180] ss:$16 sps:$4 sm:$0xff]  }
 0x105   :  { %605 = vmatpush1.bf16.msra.mxu0 %v3677_v61  ;;  %646 = vmatpush1.bf16.msra.mxu1 %v3680_v62  ;;  %v3770_v61 = vld [vmem:[#allocation9 + $0x188] ss:$16 sps:$4 sm:$0xff]   ;;  %v3775_v62 = vld [vmem:[#allocation9 + $0x1a4] ss:$16 sps:$4 sm:$0xff]  }
 0x106   :  { %606 = vmatprep.subr.bf16.mxu0 %v3685_v63  ;;  %647 = vmatprep.subr.bf16.mxu1 %v3688_v0  ;;  %v3778_v63 = vld [vmem:[#allocation9 + $0x1ac] ss:$16 sps:$4 sm:$0xff]   ;;  %v3773_v0 = vld [vmem:[#allocation9 + $0x1a0] ss:$16 sps:$4 sm:$0xff]  }
 0x109   :  { %607 = vmatpush1.bf16.msra.mxu0 %v3683_v1  ;;  %648 = vmatpush1.bf16.msra.mxu1 %v3686_v2  ;;  %v3776_v1 = vld [vmem:[#allocation9 + $0x1a8] ss:$16 sps:$4 sm:$0xff]   ;;  %v3781_v2 = vld [vmem:[#allocation9 + $0x1c4] ss:$16 sps:$4 sm:$0xff]  }
 0x10a   :  { %608 = vmatprep.subr.bf16.mxu0 %v3691_v3  ;;  %649 = vmatprep.subr.bf16.mxu1 %v3694_v4  ;;  %v3784_v3 = vld [vmem:[#allocation9 + $0x1cc] ss:$16 sps:$4 sm:$0xff]   ;;  %v3779_v4 = vld [vmem:[#allocation9 + $0x1c0] ss:$16 sps:$4 sm:$0xff]  }
 0x10d   :  { %609 = vmatpush1.bf16.msra.mxu0 %v3689_v5  ;;  %650 = vmatpush1.bf16.msra.mxu1 %v3692_v6  ;;  %v3782_v5 = vld [vmem:[#allocation9 + $0x1c8] ss:$16 sps:$4 sm:$0xff]   ;;  %v3787_v6 = vld [vmem:[#allocation9 + $0x1e4] ss:$16 sps:$4 sm:$0xff]  }
 0x10e   :  { %1064 = vmatprep.subr.bf16.mxu0 %v3697_v7  ;;  %1105 = vmatprep.subr.bf16.mxu1 %v3700_v8  ;;  %v3790_v7 = vld [vmem:[#allocation9 + $0x1ec] ss:$16 sps:$4 sm:$0xff]   ;;  %v3785_v8 = vld [vmem:[#allocation9 + $0x1e0] ss:$16 sps:$4 sm:$0xff]  }
 0x110   :  { %3223 = vmatmul.mubr.msk.bf16.vlgmr.msra.gmra.mrb[0].mxu0 %vm4499_vm1, %v4348_v44  ;;  %3225 = vmatmul.mubr.msk.bf16.vlgmr.msra.gmra.mrb[0].mxu1 %vm4499_vm1, %v4348_v44  ;;  %v3743_v44 = vld [vmem:[#allocation9 + $0x100] ss:$16 sps:$4 sm:$0xff]  }
 0x111   :  { %1065 = vmatpush1.bf16.msra.mxu0 %v3695_v10  ;;  %1106 = vmatpush1.bf16.msra.mxu1 %v3698_v11  ;;  %v676_v10 = vld [vmem:[#allocation3] sm:$0xff] }
 0x112   :  { %1066 = vmatprep.subr.bf16.mxu0 %v3703_v12  ;;  %1107 = vmatprep.subr.bf16.mxu1 %v3706_v13  ;;  %v3793_v11 = vld [vmem:[#allocation11 + $0x4] ss:$16 sps:$4 sm:$0xff]   ;;  %v3796_v12 = vld [vmem:[#allocation11 + $0xc] ss:$16 sps:$4 sm:$0xff]   ;;  %v678_v13 = vpack.c.bf16 %v676_v10, %v676_v10 }
 0x113   :  { %1096 = vmatprep.mubr.bf16.mxu0 %v679_v16  ;;  %1137 = vmatprep.mubr.bf16.mxu1 %v679_v16  ;;  %v3799_v16 = vld [vmem:[#allocation11 + $0x24] ss:$16 sps:$4 sm:$0xff]   ;;  %v3886_v10 = vld [vmem:[#allocation11 + $0x1ec] ss:$16 sps:$4 sm:$0xff]  }
 0x115   :  { %1067 = vmatpush1.bf16.msra.mxu0 %v3701_v14  ;;  %1108 = vmatpush1.bf16.msra.mxu1 %v3704_v15  ;;  %v3791_v14 = vld [vmem:[#allocation11] ss:$16 sps:$4 sm:$0xff]   ;;  %v3794_v15 = vld [vmem:[#allocation11 + $0x8] ss:$16 sps:$4 sm:$0xff]  }
 0x116   :  { %1068 = vmatprep.subr.bf16.mxu0 %v3709_v17  ;;  %1109 = vmatprep.subr.bf16.mxu1 %v3712_v18  ;;  %v3802_v17 = vld [vmem:[#allocation11 + $0x2c] ss:$16 sps:$4 sm:$0xff]   ;;  %v3797_v18 = vld [vmem:[#allocation11 + $0x20] ss:$16 sps:$4 sm:$0xff]  }
 0x119   :  { %1069 = vmatpush1.bf16.msra.mxu0 %v3707_v19  ;;  %1110 = vmatpush1.bf16.msra.mxu1 %v3710_v20  ;;  %v3800_v19 = vld [vmem:[#allocation11 + $0x28] ss:$16 sps:$4 sm:$0xff]   ;;  %v3805_v20 = vld [vmem:[#allocation11 + $0x44] ss:$16 sps:$4 sm:$0xff]  }
 0x11a   :  { %1070 = vmatprep.subr.bf16.mxu0 %v3715_v21  ;;  %1111 = vmatprep.subr.bf16.mxu1 %v3718_v22  ;;  %v3808_v21 = vld [vmem:[#allocation11 + $0x4c] ss:$16 sps:$4 sm:$0xff]   ;;  %v3803_v22 = vld [vmem:[#allocation11 + $0x40] ss:$16 sps:$4 sm:$0xff]  }
 0x11d   :  { %1071 = vmatpush1.bf16.msra.mxu0 %v3713_v23  ;;  %1112 = vmatpush1.bf16.msra.mxu1 %v3716_v24  ;;  %v3806_v23 = vld [vmem:[#allocation11 + $0x48] ss:$16 sps:$4 sm:$0xff]   ;;  %v3811_v24 = vld [vmem:[#allocation11 + $0x64] ss:$16 sps:$4 sm:$0xff]  }
 0x11e   :  { %1072 = vmatprep.subr.bf16.mxu0 %v3721_v25  ;;  %1113 = vmatprep.subr.bf16.mxu1 %v3724_v26  ;;  %v3814_v25 = vld [vmem:[#allocation11 + $0x6c] ss:$16 sps:$4 sm:$0xff]   ;;  %v3809_v26 = vld [vmem:[#allocation11 + $0x60] ss:$16 sps:$4 sm:$0xff]  }
 0x121   :  { %1073 = vmatpush1.bf16.msra.mxu0 %v3719_v27  ;;  %1114 = vmatpush1.bf16.msra.mxu1 %v3722_v28  ;;  %v3812_v27 = vld [vmem:[#allocation11 + $0x68] ss:$16 sps:$4 sm:$0xff]   ;;  %v3817_v28 = vld [vmem:[#allocation11 + $0x84] ss:$16 sps:$4 sm:$0xff]  }
 0x122   :  { %1074 = vmatprep.subr.bf16.mxu0 %v3727_v29  ;;  %1115 = vmatprep.subr.bf16.mxu1 %v3730_v30  ;;  %v3820_v29 = vld [vmem:[#allocation11 + $0x8c] ss:$16 sps:$4 sm:$0xff]   ;;  %v3815_v30 = vld [vmem:[#allocation11 + $0x80] ss:$16 sps:$4 sm:$0xff]  }
 0x125   :  { %1075 = vmatpush1.bf16.msra.mxu0 %v3725_v31  ;;  %1116 = vmatpush1.bf16.msra.mxu1 %v3728_v32  ;;  %v3818_v31 = vld [vmem:[#allocation11 + $0x88] ss:$16 sps:$4 sm:$0xff]   ;;  %v3823_v32 = vld [vmem:[#allocation11 + $0xa4] ss:$16 sps:$4 sm:$0xff]  }
 0x126   :  { %1076 = vmatprep.subr.bf16.mxu0 %v3733_v33  ;;  %1117 = vmatprep.subr.bf16.mxu1 %v3736_v34  ;;  %v3826_v33 = vld [vmem:[#allocation11 + $0xac] ss:$16 sps:$4 sm:$0xff]   ;;  %v3821_v34 = vld [vmem:[#allocation11 + $0xa0] ss:$16 sps:$4 sm:$0xff]  }
 0x129   :  { %1077 = vmatpush1.bf16.msra.mxu0 %v3731_v35  ;;  %1118 = vmatpush1.bf16.msra.mxu1 %v3734_v37  ;;  %v3824_v35 = vld [vmem:[#allocation11 + $0xa8] ss:$16 sps:$4 sm:$0xff]   ;;  %v3829_v37 = vld [vmem:[#allocation11 + $0xc4] ss:$16 sps:$4 sm:$0xff]  }
 0x12a   :  { %1078 = vmatprep.subr.bf16.mxu0 %v3739_v38  ;;  %1119 = vmatprep.subr.bf16.mxu1 %v3742_v39  ;;  %v3832_v38 = vld [vmem:[#allocation11 + $0xcc] ss:$16 sps:$4 sm:$0xff]   ;;  %v3827_v39 = vld [vmem:[#allocation11 + $0xc0] ss:$16 sps:$4 sm:$0xff]  }
 0x12d   :  { %1079 = vmatpush1.bf16.msra.mxu0 %v3737_v40  ;;  %1120 = vmatpush1.bf16.msra.mxu1 %v3740_v41  ;;  %v3830_v40 = vld [vmem:[#allocation11 + $0xc8] ss:$16 sps:$4 sm:$0xff]   ;;  %v3835_v41 = vld [vmem:[#allocation11 + $0xe4] ss:$16 sps:$4 sm:$0xff]  }
 0x12e   :  { %1080 = vmatprep.subr.bf16.mxu0 %v3745_v42  ;;  %1121 = vmatprep.subr.bf16.mxu1 %v3748_v43  ;;  %v3838_v42 = vld [vmem:[#allocation11 + $0xec] ss:$16 sps:$4 sm:$0xff]   ;;  %v3833_v43 = vld [vmem:[#allocation11 + $0xe0] ss:$16 sps:$4 sm:$0xff]  }
 0x131   :  { %1081 = vmatpush1.bf16.msra.mxu0 %v3743_v44  ;;  %1122 = vmatpush1.bf16.msra.mxu1 %v3746_v45  ;;  %v3836_v44 = vld [vmem:[#allocation11 + $0xe8] ss:$16 sps:$4 sm:$0xff]   ;;  %v3841_v45 = vld [vmem:[#allocation11 + $0x104] ss:$16 sps:$4 sm:$0xff]  }
 0x132   :  { %1082 = vmatprep.subr.bf16.mxu0 %v3751_v46  ;;  %1123 = vmatprep.subr.bf16.mxu1 %v3754_v47  ;;  %v3844_v46 = vld [vmem:[#allocation11 + $0x10c] ss:$16 sps:$4 sm:$0xff]   ;;  %v3839_v47 = vld [vmem:[#allocation11 + $0x100] ss:$16 sps:$4 sm:$0xff]  }
 0x135   :  { %1083 = vmatpush1.bf16.msra.mxu0 %v3749_v48  ;;  %1124 = vmatpush1.bf16.msra.mxu1 %v3752_v49  ;;  %v3842_v48 = vld [vmem:[#allocation11 + $0x108] ss:$16 sps:$4 sm:$0xff]   ;;  %v3847_v49 = vld [vmem:[#allocation11 + $0x124] ss:$16 sps:$4 sm:$0xff]  }
 0x136   :  { %1084 = vmatprep.subr.bf16.mxu0 %v3757_v50  ;;  %1125 = vmatprep.subr.bf16.mxu1 %v3760_v51  ;;  %v3850_v50 = vld [vmem:[#allocation11 + $0x12c] ss:$16 sps:$4 sm:$0xff]   ;;  %v3845_v51 = vld [vmem:[#allocation11 + $0x120] ss:$16 sps:$4 sm:$0xff]  }
 0x139   :  { %1085 = vmatpush1.bf16.msra.mxu0 %v3755_v52  ;;  %1126 = vmatpush1.bf16.msra.mxu1 %v3758_v53  ;;  %v3848_v52 = vld [vmem:[#allocation11 + $0x128] ss:$16 sps:$4 sm:$0xff]   ;;  %v3853_v53 = vld [vmem:[#allocation11 + $0x144] ss:$16 sps:$4 sm:$0xff]  }
 0x13a   :  { %1086 = vmatprep.subr.bf16.mxu0 %v3763_v54  ;;  %1127 = vmatprep.subr.bf16.mxu1 %v3766_v55  ;;  %v3856_v54 = vld [vmem:[#allocation11 + $0x14c] ss:$16 sps:$4 sm:$0xff]   ;;  %v3851_v55 = vld [vmem:[#allocation11 + $0x140] ss:$16 sps:$4 sm:$0xff]  }
 0x13d   :  { %1087 = vmatpush1.bf16.msra.mxu0 %v3761_v56  ;;  %1128 = vmatpush1.bf16.msra.mxu1 %v3764_v57  ;;  %v3854_v56 = vld [vmem:[#allocation11 + $0x148] ss:$16 sps:$4 sm:$0xff]   ;;  %v3859_v57 = vld [vmem:[#allocation11 + $0x164] ss:$16 sps:$4 sm:$0xff]  }
 0x13e   :  { %1088 = vmatprep.subr.bf16.mxu0 %v3769_v58  ;;  %1129 = vmatprep.subr.bf16.mxu1 %v3772_v59  ;;  %v3862_v58 = vld [vmem:[#allocation11 + $0x16c] ss:$16 sps:$4 sm:$0xff]   ;;  %v3857_v59 = vld [vmem:[#allocation11 + $0x160] ss:$16 sps:$4 sm:$0xff]  }
 0x141   :  { %1089 = vmatpush1.bf16.msra.mxu0 %v3767_v60  ;;  %1130 = vmatpush1.bf16.msra.mxu1 %v3770_v61  ;;  %v3860_v60 = vld [vmem:[#allocation11 + $0x168] ss:$16 sps:$4 sm:$0xff]   ;;  %v3865_v61 = vld [vmem:[#allocation11 + $0x184] ss:$16 sps:$4 sm:$0xff]  }
 0x142   :  { %1090 = vmatprep.subr.bf16.mxu0 %v3775_v62  ;;  %1131 = vmatprep.subr.bf16.mxu1 %v3778_v63  ;;  %v3868_v62 = vld [vmem:[#allocation11 + $0x18c] ss:$16 sps:$4 sm:$0xff]   ;;  %v3863_v63 = vld [vmem:[#allocation11 + $0x180] ss:$16 sps:$4 sm:$0xff]  }
 0x145   :  { %1091 = vmatpush1.bf16.msra.mxu0 %v3773_v0  ;;  %1132 = vmatpush1.bf16.msra.mxu1 %v3776_v1  ;;  %v3866_v0 = vld [vmem:[#allocation11 + $0x188] ss:$16 sps:$4 sm:$0xff]   ;;  %v3871_v1 = vld [vmem:[#allocation11 + $0x1a4] ss:$16 sps:$4 sm:$0xff]  }
 0x146   :  { %1092 = vmatprep.subr.bf16.mxu0 %v3781_v2  ;;  %1133 = vmatprep.subr.bf16.mxu1 %v3784_v3  ;;  %v3874_v2 = vld [vmem:[#allocation11 + $0x1ac] ss:$16 sps:$4 sm:$0xff]   ;;  %v3869_v3 = vld [vmem:[#allocation11 + $0x1a0] ss:$16 sps:$4 sm:$0xff]  }
 0x149   :  { %1093 = vmatpush1.bf16.msra.mxu0 %v3779_v4  ;;  %1134 = vmatpush1.bf16.msra.mxu1 %v3782_v5  ;;  %v3872_v4 = vld [vmem:[#allocation11 + $0x1a8] ss:$16 sps:$4 sm:$0xff]   ;;  %v3877_v5 = vld [vmem:[#allocation11 + $0x1c4] ss:$16 sps:$4 sm:$0xff]  }
 0x14a   :  { %1094 = vmatprep.subr.bf16.mxu0 %v3787_v6  ;;  %1135 = vmatprep.subr.bf16.mxu1 %v3790_v7  ;;  %v3880_v6 = vld [vmem:[#allocation11 + $0x1cc] ss:$16 sps:$4 sm:$0xff]   ;;  %v3875_v7 = vld [vmem:[#allocation11 + $0x1c0] ss:$16 sps:$4 sm:$0xff]  }
 0x14d   :  { %1095 = vmatpush1.bf16.msra.mxu0 %v3785_v8  ;;  %1136 = vmatpush1.bf16.msra.mxu1 %v3788_v9  ;;  %v3878_v8 = vld [vmem:[#allocation11 + $0x1c8] ss:$16 sps:$4 sm:$0xff]   ;;  %v3883_v9 = vld [vmem:[#allocation11 + $0x1e4] ss:$16 sps:$4 sm:$0xff]  }
 0x14e   :  { %1952 = vmatprep.subr.bf16.mxu0 %v3793_v11  ;;  %2034 = vmatprep.subr.bf16.mxu1 %v3796_v12  ;;  %v3881_v11 = vld [vmem:[#allocation11 + $0x1e0] ss:$16 sps:$4 sm:$0xff]   ;;  %v3884_v12 = vld [vmem:[#allocation11 + $0x1e8] ss:$16 sps:$4 sm:$0xff]  }
 0x150   :  { %1097 = vmatmul.mubr.bf16.vlgmr.msra.gmra.mrb[0].mxu0 %v678_v13  ;;  %1138 = vmatmul.mubr.bf16.vlgmr.msra.gmra.mrb[0].mxu1 %v678_v13  ;;  %v3889_v13 = vld [vmem:[#allocation11 + $0x204] ss:$16 sps:$4 sm:$0xff]  }
 0x151   :  { %1953 = vmatpush1.bf16.msra.mxu0 %v3791_v14  ;;  %2035 = vmatpush1.bf16.msra.mxu1 %v3794_v15  ;;  %v3892_v14 = vld [vmem:[#allocation11 + $0x20c] ss:$16 sps:$4 sm:$0xff]  }
 0x152   :  { %1954 = vmatprep.subr.bf16.mxu0 %v3799_v16  ;;  %2036 = vmatprep.subr.bf16.mxu1 %v3802_v17 }
 0x155   :  { %1955 = vmatpush1.bf16.msra.mxu0 %v3797_v18  ;;  %2037 = vmatpush1.bf16.msra.mxu1 %v3800_v19 }
 0x156   :  { %1956 = vmatprep.subr.bf16.mxu0 %v3805_v20  ;;  %2038 = vmatprep.subr.bf16.mxu1 %v3808_v21 }
 0x159   :  { %1957 = vmatpush1.bf16.msra.mxu0 %v3803_v22  ;;  %2039 = vmatpush1.bf16.msra.mxu1 %v3806_v23 }
 0x15a   :  { %1958 = vmatprep.subr.bf16.mxu0 %v3811_v24  ;;  %2040 = vmatprep.subr.bf16.mxu1 %v3814_v25 }
 0x15d   :  { %1959 = vmatpush1.bf16.msra.mxu0 %v3809_v26  ;;  %2041 = vmatpush1.bf16.msra.mxu1 %v3812_v27 }
 0x15e   :  { %1960 = vmatprep.subr.bf16.mxu0 %v3817_v28  ;;  %2042 = vmatprep.subr.bf16.mxu1 %v3820_v29 }
 0x161   :  { %1961 = vmatpush1.bf16.msra.mxu0 %v3815_v30  ;;  %2043 = vmatpush1.bf16.msra.mxu1 %v3818_v31  ;;  %v3887_v30 = vld [vmem:[#allocation11 + $0x200] ss:$16 sps:$4 sm:$0xff]   ;;  %v3890_v31 = vld [vmem:[#allocation11 + $0x208] ss:$16 sps:$4 sm:$0xff]  }
 0x162   :  { %1962 = vmatprep.subr.bf16.mxu0 %v3823_v32  ;;  %2044 = vmatprep.subr.bf16.mxu1 %v3826_v33  ;;  %v3895_v33 = vld [vmem:[#allocation11 + $0x224] ss:$16 sps:$4 sm:$0xff]  }
 0x165   :  { %1963 = vmatpush1.bf16.msra.mxu0 %v3821_v34  ;;  %2045 = vmatpush1.bf16.msra.mxu1 %v3824_v35  ;;  %v3898_v34 = vld [vmem:[#allocation11 + $0x22c] ss:$16 sps:$4 sm:$0xff]  }
 0x166   :  { %1964 = vmatprep.subr.bf16.mxu0 %v3829_v37  ;;  %2046 = vmatprep.subr.bf16.mxu1 %v3832_v38  ;;  %v3893_v37 = vld [vmem:[#allocation11 + $0x220] ss:$16 sps:$4 sm:$0xff]   ;;  %v3896_v38 = vld [vmem:[#allocation11 + $0x228] ss:$16 sps:$4 sm:$0xff]  }
 0x169   :  { %1965 = vmatpush1.bf16.msra.mxu0 %v3827_v39  ;;  %2047 = vmatpush1.bf16.msra.mxu1 %v3830_v40  ;;  %v3901_v39 = vld [vmem:[#allocation11 + $0x244] ss:$16 sps:$4 sm:$0xff]   ;;  %v3904_v40 = vld [vmem:[#allocation11 + $0x24c] ss:$16 sps:$4 sm:$0xff]  }
 0x16a   :  { %1966 = vmatprep.subr.bf16.mxu0 %v3835_v41  ;;  %2048 = vmatprep.subr.bf16.mxu1 %v3838_v42  ;;  %v3899_v41 = vld [vmem:[#allocation11 + $0x240] ss:$16 sps:$4 sm:$0xff]   ;;  %v3902_v42 = vld [vmem:[#allocation11 + $0x248] ss:$16 sps:$4 sm:$0xff]  }
 0x16d   :  { %1967 = vmatpush1.bf16.msra.mxu0 %v3833_v43  ;;  %2049 = vmatpush1.bf16.msra.mxu1 %v3836_v44  ;;  %v3907_v43 = vld [vmem:[#allocation11 + $0x264] ss:$16 sps:$4 sm:$0xff]   ;;  %v3910_v44 = vld [vmem:[#allocation11 + $0x26c] ss:$16 sps:$4 sm:$0xff]  }
 0x16e   :  { %1968 = vmatprep.subr.bf16.mxu0 %v3841_v45  ;;  %2050 = vmatprep.subr.bf16.mxu1 %v3844_v46  ;;  %v3905_v45 = vld [vmem:[#allocation11 + $0x260] ss:$16 sps:$4 sm:$0xff]   ;;  %v3908_v46 = vld [vmem:[#allocation11 + $0x268] ss:$16 sps:$4 sm:$0xff]  }
 0x171   :  { %1969 = vmatpush1.bf16.msra.mxu0 %v3839_v47  ;;  %2051 = vmatpush1.bf16.msra.mxu1 %v3842_v48  ;;  %v3913_v47 = vld [vmem:[#allocation11 + $0x284] ss:$16 sps:$4 sm:$0xff]   ;;  %v3916_v48 = vld [vmem:[#allocation11 + $0x28c] ss:$16 sps:$4 sm:$0xff]  }
 0x172   :  { %1970 = vmatprep.subr.bf16.mxu0 %v3847_v49  ;;  %2052 = vmatprep.subr.bf16.mxu1 %v3850_v50  ;;  %v3911_v49 = vld [vmem:[#allocation11 + $0x280] ss:$16 sps:$4 sm:$0xff]   ;;  %v3914_v50 = vld [vmem:[#allocation11 + $0x288] ss:$16 sps:$4 sm:$0xff]  }
 0x175   :  { %1971 = vmatpush1.bf16.msra.mxu0 %v3845_v51  ;;  %2053 = vmatpush1.bf16.msra.mxu1 %v3848_v52  ;;  %v3919_v51 = vld [vmem:[#allocation11 + $0x2a4] ss:$16 sps:$4 sm:$0xff]   ;;  %v3922_v52 = vld [vmem:[#allocation11 + $0x2ac] ss:$16 sps:$4 sm:$0xff]  }
 0x176   :  { %1972 = vmatprep.subr.bf16.mxu0 %v3853_v53  ;;  %2054 = vmatprep.subr.bf16.mxu1 %v3856_v54  ;;  %v3917_v53 = vld [vmem:[#allocation11 + $0x2a0] ss:$16 sps:$4 sm:$0xff]   ;;  %v3920_v54 = vld [vmem:[#allocation11 + $0x2a8] ss:$16 sps:$4 sm:$0xff]  }
 0x179   :  { %1973 = vmatpush1.bf16.msra.mxu0 %v3851_v55  ;;  %2055 = vmatpush1.bf16.msra.mxu1 %v3854_v56  ;;  %v3925_v55 = vld [vmem:[#allocation11 + $0x2c4] ss:$16 sps:$4 sm:$0xff]   ;;  %v3928_v56 = vld [vmem:[#allocation11 + $0x2cc] ss:$16 sps:$4 sm:$0xff]  }
 0x17a   :  { %1974 = vmatprep.subr.bf16.mxu0 %v3859_v57  ;;  %2056 = vmatprep.subr.bf16.mxu1 %v3862_v58  ;;  %v3923_v57 = vld [vmem:[#allocation11 + $0x2c0] ss:$16 sps:$4 sm:$0xff]   ;;  %v3926_v58 = vld [vmem:[#allocation11 + $0x2c8] ss:$16 sps:$4 sm:$0xff]  }
 0x17d   :  { %1975 = vmatpush1.bf16.msra.mxu0 %v3857_v59  ;;  %2057 = vmatpush1.bf16.msra.mxu1 %v3860_v60  ;;  %v3931_v59 = vld [vmem:[#allocation11 + $0x2e4] ss:$16 sps:$4 sm:$0xff]   ;;  %v3934_v60 = vld [vmem:[#allocation11 + $0x2ec] ss:$16 sps:$4 sm:$0xff]  }
 0x17e   :  { %1976 = vmatprep.subr.bf16.mxu0 %v3865_v61  ;;  %2058 = vmatprep.subr.bf16.mxu1 %v3868_v62  ;;  %v3929_v61 = vld [vmem:[#allocation11 + $0x2e0] ss:$16 sps:$4 sm:$0xff]   ;;  %v3932_v62 = vld [vmem:[#allocation11 + $0x2e8] ss:$16 sps:$4 sm:$0xff]  }
 0x181   :  { %1977 = vmatpush1.bf16.msra.mxu0 %v3863_v63  ;;  %2059 = vmatpush1.bf16.msra.mxu1 %v3866_v0  ;;  %v3937_v63 = vld [vmem:[#allocation11 + $0x304] ss:$16 sps:$4 sm:$0xff]   ;;  %v3940_v0 = vld [vmem:[#allocation11 + $0x30c] ss:$16 sps:$4 sm:$0xff]  }
 0x182   :  { %1978 = vmatprep.subr.bf16.mxu0 %v3871_v1  ;;  %2060 = vmatprep.subr.bf16.mxu1 %v3874_v2  ;;  %v3935_v1 = vld [vmem:[#allocation11 + $0x300] ss:$16 sps:$4 sm:$0xff]   ;;  %v3938_v2 = vld [vmem:[#allocation11 + $0x308] ss:$16 sps:$4 sm:$0xff]  }
 0x185   :  { %1979 = vmatpush1.bf16.msra.mxu0 %v3869_v3  ;;  %2061 = vmatpush1.bf16.msra.mxu1 %v3872_v4  ;;  %v3943_v3 = vld [vmem:[#allocation11 + $0x324] ss:$16 sps:$4 sm:$0xff]   ;;  %v3946_v4 = vld [vmem:[#allocation11 + $0x32c] ss:$16 sps:$4 sm:$0xff]  }
 0x186   :  { %1980 = vmatprep.subr.bf16.mxu0 %v3877_v5  ;;  %2062 = vmatprep.subr.bf16.mxu1 %v3880_v6  ;;  %v3941_v5 = vld [vmem:[#allocation11 + $0x320] ss:$16 sps:$4 sm:$0xff]   ;;  %v3944_v6 = vld [vmem:[#allocation11 + $0x328] ss:$16 sps:$4 sm:$0xff]  }
 0x189   :  { %1981 = vmatpush1.bf16.msra.mxu0 %v3875_v7  ;;  %2063 = vmatpush1.bf16.msra.mxu1 %v3878_v8  ;;  %v3949_v7 = vld [vmem:[#allocation11 + $0x344] ss:$16 sps:$4 sm:$0xff]   ;;  %v3952_v8 = vld [vmem:[#allocation11 + $0x34c] ss:$16 sps:$4 sm:$0xff]  }
 0x18a   :  { %1982 = vmatprep.subr.bf16.mxu0 %v3883_v9  ;;  %2064 = vmatprep.subr.bf16.mxu1 %v3886_v10  ;;  %v3947_v9 = vld [vmem:[#allocation11 + $0x340] ss:$16 sps:$4 sm:$0xff]   ;;  %v3950_v10 = vld [vmem:[#allocation11 + $0x348] ss:$16 sps:$4 sm:$0xff]  }
 0x18d   :  { %1983 = vmatpush1.bf16.msra.mxu0 %v3881_v11  ;;  %2065 = vmatpush1.bf16.msra.mxu1 %v3884_v12  ;;  %v3955_v11 = vld [vmem:[#allocation11 + $0x364] ss:$16 sps:$4 sm:$0xff]   ;;  %v3958_v12 = vld [vmem:[#allocation11 + $0x36c] ss:$16 sps:$4 sm:$0xff]  }
 0x18e   :  { %1993 = vmatprep.subr.bf16.mxu0 %v3889_v13  ;;  %2075 = vmatprep.subr.bf16.mxu1 %v3892_v14  ;;  %v3953_v13 = vld [vmem:[#allocation11 + $0x360] ss:$16 sps:$4 sm:$0xff]   ;;  %v3956_v14 = vld [vmem:[#allocation11 + $0x368] ss:$16 sps:$4 sm:$0xff]  }
 0x223   :  { %v1098_v15 = vpop.f32.mrb[0].mxu0  ;;  %v4517_v16 = vpop.f32.mrb[0].mxu1 }
 0x224   :  { %vm1146_vm2 = vcmp.gt.f32.partialorder %v1098_v15, 0.0  ;;  %v1150_v17 = vmul.f32 0.2, %v1098_v15  ;;  %v1100_v18 = vpop.f32.mrb[1].mxu0  ;;  %v1141_v19 = vpop.f32.mrb[1].mxu1  ;;  %vm1148_vm5 = vcmp.gt.f32.partialorder %v4517_v16, 0.0 }
 0x225   :  { %vm1147_vm3 = vcmp.gt.f32.partialorder %v1100_v18, 0.0  ;;  %v1151_v20 = vmul.f32 0.2, %v1100_v18  ;;  %v1102_v21 = vpop.f32.mrb[2].mxu0  ;;  %v1143_v22 = vpop.f32.mrb[2].mxu1  ;;  %vm1149_vm4 = vcmp.gt.f32.partialorder %v1141_v19, 0.0 }
 0x226   :  { %v1154_v23 = vsel %vm1146_vm2, %v1098_v15, %v1150_v17  ;;  %v1153_v24 = vmul.f32 0.2, %v1141_v19  ;;  %v1103_v25 = vpop.f32.mrb[3].mxu0  ;;  %v1144_v26 = vpop.f32.mrb[3].mxu1  ;;  %v3961_v15 = vld [vmem:[#allocation11 + $0x384] ss:$16 sps:$4 sm:$0xff]  }
 0x227   :  { %v1155_v27 = vsel %vm1147_vm3, %v1100_v18, %v1151_v20  ;;  %v1158_v32 = vpack.c.bf16 %v1154_v23, %v1154_v23  ;;  %v3964_v17 = vld [vmem:[#allocation11 + $0x38c] ss:$16 sps:$4 sm:$0xff]   ;;  %v3959_v18 = vld [vmem:[#allocation11 + $0x380] ss:$16 sps:$4 sm:$0xff]   ;;  %v3967_v20 = vld [vmem:[#allocation11 + $0x3a4] ss:$16 sps:$4 sm:$0xff]  }
 0x228   :  { %v1159_v28 = vpack.c.bf16 %v1155_v27, %v1155_v27  ;;  %v1157_v29 = vsel %vm1149_vm4, %v1141_v19, %v1153_v24  ;;  %v3962_v19 = vld [vmem:[#allocation11 + $0x388] ss:$16 sps:$4 sm:$0xff]   ;;  %v3970_v21 = vld [vmem:[#allocation11 + $0x3ac] ss:$16 sps:$4 sm:$0xff]   ;;  %v3965_v22 = vld [vmem:[#allocation11 + $0x3a0] ss:$16 sps:$4 sm:$0xff]  }
 0x229   :  { %v1161_v35 = vpack.c.bf16 %v1157_v29, %v1157_v29  ;;  %v3968_v23 = vld [vmem:[#allocation11 + $0x3a8] ss:$16 sps:$4 sm:$0xff]   ;;  %v3973_v24 = vld [vmem:[#allocation11 + $0x3c4] ss:$16 sps:$4 sm:$0xff]   ;;  %v3976_v25 = vld [vmem:[#allocation11 + $0x3cc] ss:$16 sps:$4 sm:$0xff]  }
 0x22a   :  { %1984 = vmatprep.mubr.bf16.mxu0 %v1159_v28  ;;  %2066 = vmatprep.mubr.bf16.mxu1 %v1159_v28  ;;  %v3971_v26 = vld [vmem:[#allocation11 + $0x3c0] ss:$16 sps:$4 sm:$0xff]   ;;  %v3974_v27 = vld [vmem:[#allocation11 + $0x3c8] ss:$16 sps:$4 sm:$0xff]   ;;  %v3979_v28 = vld [vmem:[#allocation11 + $0x3e4] ss:$16 sps:$4 sm:$0xff]  }
 0x22b   :  { %1985 = vmatmul.mubr.bf16.vlgmr.msra.gmra.mrb[4].mxu0 %v1158_v32  ;;  %2067 = vmatmul.mubr.bf16.vlgmr.msra.gmra.mrb[4].mxu1 %v1158_v32  ;;  %v3982_v29 = vld [vmem:[#allocation11 + $0x3ec] ss:$16 sps:$4 sm:$0xff]   ;;  %v3980_v32 = vld [vmem:[#allocation11 + $0x3e8] ss:$16 sps:$4 sm:$0xff]  }
 0x22c   :  { %1994 = vmatpush1.bf16.msra.mxu0 %v3887_v30  ;;  %2076 = vmatpush1.bf16.msra.mxu1 %v3890_v31  ;;  %v1152_v30 = vmul.f32 0.2, %v4517_v16  ;;  %v3977_v31 = vld [vmem:[#allocation11 + $0x3e0] ss:$16 sps:$4 sm:$0xff]  }
 0x22d   :  { %2025 = vmatprep.mubr.bf16.mxu0 %v1161_v35  ;;  %2107 = vmatprep.mubr.bf16.mxu1 %v1161_v35 }
 0x22e   :  { %1995 = vmatprep.subr.bf16.mxu0 %v3895_v33  ;;  %2077 = vmatprep.subr.bf16.mxu1 %v3898_v34  ;;  %v3985_v33 = vld [vmem:[#allocation12 + $0x4] ss:$16 sps:$4 sm:$0xff]   ;;  %v3988_v34 = vld [vmem:[#allocation12 + $0xc] ss:$16 sps:$4 sm:$0xff]   ;;  %v1156_v35 = vsel %vm1148_vm5, %v4517_v16, %v1152_v30  ;;  %v3995_v16 = vld [vmem:[#allocation12 + $0x40] ss:$16 sps:$4 sm:$0xff]  }
 0x22f   :  { %v4067_v30 = vld [vmem:[#allocation12 + $0x1c0] ss:$16 sps:$4 sm:$0xff]  }
 0x230   :  { %1996 = vmatpush1.bf16.msra.mxu0 %v3893_v37  ;;  %2078 = vmatpush1.bf16.msra.mxu1 %v3896_v38  ;;  %v3983_v37 = vld [vmem:[#allocation12] ss:$16 sps:$4 sm:$0xff]   ;;  %v3986_v38 = vld [vmem:[#allocation12 + $0x8] ss:$16 sps:$4 sm:$0xff]  }
 0x231   :  { %1997 = vmatprep.subr.bf16.mxu0 %v3901_v39  ;;  %2079 = vmatprep.subr.bf16.mxu1 %v3904_v40  ;;  %v1160_v39 = vpack.c.bf16 %v1156_v35, %v1156_v35  ;;  %v3991_v40 = vld [vmem:[#allocation12 + $0x24] ss:$16 sps:$4 sm:$0xff]   ;;  %v4076_v35 = vld [vmem:[#allocation12 + $0x1e8] ss:$16 sps:$4 sm:$0xff]  }
 0x234   :  { %1998 = vmatpush1.bf16.msra.mxu0 %v3899_v41  ;;  %2080 = vmatpush1.bf16.msra.mxu1 %v3902_v42  ;;  %v3994_v41 = vld [vmem:[#allocation12 + $0x2c] ss:$16 sps:$4 sm:$0xff]   ;;  %v3989_v42 = vld [vmem:[#allocation12 + $0x20] ss:$16 sps:$4 sm:$0xff]  }
 0x235   :  { %1999 = vmatprep.subr.bf16.mxu0 %v3907_v43  ;;  %2081 = vmatprep.subr.bf16.mxu1 %v3910_v44  ;;  %v3992_v43 = vld [vmem:[#allocation12 + $0x28] ss:$16 sps:$4 sm:$0xff]   ;;  %v3997_v44 = vld [vmem:[#allocation12 + $0x44] ss:$16 sps:$4 sm:$0xff]  }
 0x238   :  { %2000 = vmatpush1.bf16.msra.mxu0 %v3905_v45  ;;  %2082 = vmatpush1.bf16.msra.mxu1 %v3908_v46  ;;  %v4000_v45 = vld [vmem:[#allocation12 + $0x4c] ss:$16 sps:$4 sm:$0xff]   ;;  %v3998_v46 = vld [vmem:[#allocation12 + $0x48] ss:$16 sps:$4 sm:$0xff]  }
 0x239   :  { %2001 = vmatprep.subr.bf16.mxu0 %v3913_v47  ;;  %2083 = vmatprep.subr.bf16.mxu1 %v3916_v48  ;;  %v4003_v47 = vld [vmem:[#allocation12 + $0x64] ss:$16 sps:$4 sm:$0xff]   ;;  %v4006_v48 = vld [vmem:[#allocation12 + $0x6c] ss:$16 sps:$4 sm:$0xff]  }
 0x23c   :  { %2002 = vmatpush1.bf16.msra.mxu0 %v3911_v49  ;;  %2084 = vmatpush1.bf16.msra.mxu1 %v3914_v50  ;;  %v4001_v49 = vld [vmem:[#allocation12 + $0x60] ss:$16 sps:$4 sm:$0xff]   ;;  %v4004_v50 = vld [vmem:[#allocation12 + $0x68] ss:$16 sps:$4 sm:$0xff]  }
 0x23d   :  { %2003 = vmatprep.subr.bf16.mxu0 %v3919_v51  ;;  %2085 = vmatprep.subr.bf16.mxu1 %v3922_v52  ;;  %v4009_v51 = vld [vmem:[#allocation12 + $0x84] ss:$16 sps:$4 sm:$0xff]   ;;  %v4012_v52 = vld [vmem:[#allocation12 + $0x8c] ss:$16 sps:$4 sm:$0xff]  }
 0x240   :  { %2004 = vmatpush1.bf16.msra.mxu0 %v3917_v53  ;;  %2086 = vmatpush1.bf16.msra.mxu1 %v3920_v54  ;;  %v4007_v53 = vld [vmem:[#allocation12 + $0x80] ss:$16 sps:$4 sm:$0xff]   ;;  %v4010_v54 = vld [vmem:[#allocation12 + $0x88] ss:$16 sps:$4 sm:$0xff]  }
 0x241   :  { %2005 = vmatprep.subr.bf16.mxu0 %v3925_v55  ;;  %2087 = vmatprep.subr.bf16.mxu1 %v3928_v56  ;;  %v4015_v55 = vld [vmem:[#allocation12 + $0xa4] ss:$16 sps:$4 sm:$0xff]   ;;  %v4018_v56 = vld [vmem:[#allocation12 + $0xac] ss:$16 sps:$4 sm:$0xff]  }
 0x244   :  { %2006 = vmatpush1.bf16.msra.mxu0 %v3923_v57  ;;  %2088 = vmatpush1.bf16.msra.mxu1 %v3926_v58  ;;  %v4013_v57 = vld [vmem:[#allocation12 + $0xa0] ss:$16 sps:$4 sm:$0xff]   ;;  %v4016_v58 = vld [vmem:[#allocation12 + $0xa8] ss:$16 sps:$4 sm:$0xff]  }
 0x245   :  { %2007 = vmatprep.subr.bf16.mxu0 %v3931_v59  ;;  %2089 = vmatprep.subr.bf16.mxu1 %v3934_v60  ;;  %v4021_v59 = vld [vmem:[#allocation12 + $0xc4] ss:$16 sps:$4 sm:$0xff]   ;;  %v4024_v60 = vld [vmem:[#allocation12 + $0xcc] ss:$16 sps:$4 sm:$0xff]  }
 0x248   :  { %2008 = vmatpush1.bf16.msra.mxu0 %v3929_v61  ;;  %2090 = vmatpush1.bf16.msra.mxu1 %v3932_v62  ;;  %v4019_v61 = vld [vmem:[#allocation12 + $0xc0] ss:$16 sps:$4 sm:$0xff]   ;;  %v4022_v62 = vld [vmem:[#allocation12 + $0xc8] ss:$16 sps:$4 sm:$0xff]  }
 0x249   :  { %2009 = vmatprep.subr.bf16.mxu0 %v3937_v63  ;;  %2091 = vmatprep.subr.bf16.mxu1 %v3940_v0  ;;  %v4027_v63 = vld [vmem:[#allocation12 + $0xe4] ss:$16 sps:$4 sm:$0xff]   ;;  %v4030_v0 = vld [vmem:[#allocation12 + $0xec] ss:$16 sps:$4 sm:$0xff]  }
 0x24c   :  { %2010 = vmatpush1.bf16.msra.mxu0 %v3935_v1  ;;  %2092 = vmatpush1.bf16.msra.mxu1 %v3938_v2  ;;  %v4025_v1 = vld [vmem:[#allocation12 + $0xe0] ss:$16 sps:$4 sm:$0xff]   ;;  %v4028_v2 = vld [vmem:[#allocation12 + $0xe8] ss:$16 sps:$4 sm:$0xff]  }
 0x24d   :  { %2011 = vmatprep.subr.bf16.mxu0 %v3943_v3  ;;  %2093 = vmatprep.subr.bf16.mxu1 %v3946_v4  ;;  %v4033_v3 = vld [vmem:[#allocation12 + $0x104] ss:$16 sps:$4 sm:$0xff]   ;;  %v4036_v4 = vld [vmem:[#allocation12 + $0x10c] ss:$16 sps:$4 sm:$0xff]  }
 0x250   :  { %2012 = vmatpush1.bf16.msra.mxu0 %v3941_v5  ;;  %2094 = vmatpush1.bf16.msra.mxu1 %v3944_v6  ;;  %v4031_v5 = vld [vmem:[#allocation12 + $0x100] ss:$16 sps:$4 sm:$0xff]   ;;  %v4034_v6 = vld [vmem:[#allocation12 + $0x108] ss:$16 sps:$4 sm:$0xff]  }
 0x251   :  { %2013 = vmatprep.subr.bf16.mxu0 %v3949_v7  ;;  %2095 = vmatprep.subr.bf16.mxu1 %v3952_v8  ;;  %v4039_v7 = vld [vmem:[#allocation12 + $0x124] ss:$16 sps:$4 sm:$0xff]   ;;  %v4042_v8 = vld [vmem:[#allocation12 + $0x12c] ss:$16 sps:$4 sm:$0xff]  }
 0x254   :  { %2014 = vmatpush1.bf16.msra.mxu0 %v3947_v9  ;;  %2096 = vmatpush1.bf16.msra.mxu1 %v3950_v10  ;;  %v4037_v9 = vld [vmem:[#allocation12 + $0x120] ss:$16 sps:$4 sm:$0xff]   ;;  %v4040_v10 = vld [vmem:[#allocation12 + $0x128] ss:$16 sps:$4 sm:$0xff]  }
 0x255   :  { %2015 = vmatprep.subr.bf16.mxu0 %v3955_v11  ;;  %2097 = vmatprep.subr.bf16.mxu1 %v3958_v12  ;;  %v4045_v11 = vld [vmem:[#allocation12 + $0x144] ss:$16 sps:$4 sm:$0xff]   ;;  %v4048_v12 = vld [vmem:[#allocation12 + $0x14c] ss:$16 sps:$4 sm:$0xff]  }
 0x258   :  { %2016 = vmatpush1.bf16.msra.mxu0 %v3953_v13  ;;  %2098 = vmatpush1.bf16.msra.mxu1 %v3956_v14  ;;  %v4043_v13 = vld [vmem:[#allocation12 + $0x140] ss:$16 sps:$4 sm:$0xff]   ;;  %v4046_v14 = vld [vmem:[#allocation12 + $0x148] ss:$16 sps:$4 sm:$0xff]  }
 0x259   :  { %2017 = vmatprep.subr.bf16.mxu0 %v3961_v15  ;;  %2099 = vmatprep.subr.bf16.mxu1 %v3964_v17  ;;  %v4051_v15 = vld [vmem:[#allocation12 + $0x164] ss:$16 sps:$4 sm:$0xff]   ;;  %v4054_v17 = vld [vmem:[#allocation12 + $0x16c] ss:$16 sps:$4 sm:$0xff]  }
 0x25c   :  { %2018 = vmatpush1.bf16.msra.mxu0 %v3959_v18  ;;  %2100 = vmatpush1.bf16.msra.mxu1 %v3962_v19  ;;  %v4049_v18 = vld [vmem:[#allocation12 + $0x160] ss:$16 sps:$4 sm:$0xff]   ;;  %v4052_v19 = vld [vmem:[#allocation12 + $0x168] ss:$16 sps:$4 sm:$0xff]  }
 0x25d   :  { %2019 = vmatprep.subr.bf16.mxu0 %v3967_v20  ;;  %2101 = vmatprep.subr.bf16.mxu1 %v3970_v21  ;;  %v4057_v20 = vld [vmem:[#allocation12 + $0x184] ss:$16 sps:$4 sm:$0xff]   ;;  %v4060_v21 = vld [vmem:[#allocation12 + $0x18c] ss:$16 sps:$4 sm:$0xff]  }
 0x260   :  { %2020 = vmatpush1.bf16.msra.mxu0 %v3965_v22  ;;  %2102 = vmatpush1.bf16.msra.mxu1 %v3968_v23  ;;  %v4055_v22 = vld [vmem:[#allocation12 + $0x180] ss:$16 sps:$4 sm:$0xff]   ;;  %v4058_v23 = vld [vmem:[#allocation12 + $0x188] ss:$16 sps:$4 sm:$0xff]  }
 0x261   :  { %2021 = vmatprep.subr.bf16.mxu0 %v3973_v24  ;;  %2103 = vmatprep.subr.bf16.mxu1 %v3976_v25  ;;  %v4063_v24 = vld [vmem:[#allocation12 + $0x1a4] ss:$16 sps:$4 sm:$0xff]   ;;  %v4066_v25 = vld [vmem:[#allocation12 + $0x1ac] ss:$16 sps:$4 sm:$0xff]  }
 0x264   :  { %2022 = vmatpush1.bf16.msra.mxu0 %v3971_v26  ;;  %2104 = vmatpush1.bf16.msra.mxu1 %v3974_v27  ;;  %v4061_v26 = vld [vmem:[#allocation12 + $0x1a0] ss:$16 sps:$4 sm:$0xff]   ;;  %v4064_v27 = vld [vmem:[#allocation12 + $0x1a8] ss:$16 sps:$4 sm:$0xff]  }
 0x265   :  { %2023 = vmatprep.subr.bf16.mxu0 %v3979_v28  ;;  %2105 = vmatprep.subr.bf16.mxu1 %v3982_v29  ;;  %v4069_v28 = vld [vmem:[#allocation12 + $0x1c4] ss:$16 sps:$4 sm:$0xff]   ;;  %v4072_v29 = vld [vmem:[#allocation12 + $0x1cc] ss:$16 sps:$4 sm:$0xff]  }
 0x268   :  { %2024 = vmatpush1.bf16.msra.mxu0 %v3977_v31  ;;  %2106 = vmatpush1.bf16.msra.mxu1 %v3980_v32  ;;  %v4070_v31 = vld [vmem:[#allocation12 + $0x1c8] ss:$16 sps:$4 sm:$0xff]   ;;  %v4075_v32 = vld [vmem:[#allocation12 + $0x1e4] ss:$16 sps:$4 sm:$0xff]  }
 0x269   :  { %2923 = vmatprep.subr.bf16.mxu0 %v3985_v33  ;;  %3005 = vmatprep.subr.bf16.mxu1 %v3988_v34  ;;  %v4078_v33 = vld [vmem:[#allocation12 + $0x1ec] ss:$16 sps:$4 sm:$0xff]   ;;  %v4073_v34 = vld [vmem:[#allocation12 + $0x1e0] ss:$16 sps:$4 sm:$0xff]  }
 0x26b   :  { %2026 = vmatmul.mubr.bf16.vlgmr.msra.gmra.mrb[4].mxu0 %v1160_v39  ;;  %2108 = vmatmul.mubr.bf16.vlgmr.msra.gmra.mrb[4].mxu1 %v1160_v39  ;;  %v4523_v39 = vshrl.u32 %v119_v36, 7 }
 0x26c   :  { %2924 = vmatpush1.bf16.msra.mxu0 %v3983_v37  ;;  %3006 = vmatpush1.bf16.msra.mxu1 %v3986_v38  ;;  %v4081_v37 = vld [vmem:[#allocation12 + $0x204] ss:$16 sps:$4 sm:$0xff]   ;;  %v4084_v38 = vld [vmem:[#allocation12 + $0x20c] ss:$16 sps:$4 sm:$0xff]  }
 0x26d   :  { %2925 = vmatprep.subr.bf16.mxu0 %v3991_v40  ;;  %3007 = vmatprep.subr.bf16.mxu1 %v3994_v41  ;;  %v4526_v40 = vsub.s32 0, %v4523_v39  ;;  %v4531_v41 = vld [vmem:[%s4590_s8] ss:$2 sm:$0xf] }
 0x270   :  { %2926 = vmatpush1.bf16.msra.mxu0 %v3989_v42  ;;  %3008 = vmatpush1.bf16.msra.mxu1 %v3992_v43  ;;  %v4534_v42 = vsub.s32 1, %v4523_v39  ;;  %v4537_v43 = vsub.s32 3, %v4523_v39 }
 0x271   :  { %2927 = vmatprep.subr.bf16.mxu0 %v3997_v44  ;;  %3009 = vmatprep.subr.bf16.mxu1 %v4000_v45  ;;  %v1295_v44 = vrot.slane %v4531_v41, %v4526_v40 }
 0x272   :  { %v1299_v36 = vrot.slane %v4531_v41, %v4534_v42  ;;  %v1307_v45 = vrot.slane %v4531_v41, %v4537_v43 }
 0x274   :  { %2928 = vmatpush1.bf16.msra.mxu0 %v3995_v16  ;;  %3010 = vmatpush1.bf16.msra.mxu1 %v3998_v46 }
 0x275   :  { %2929 = vmatprep.subr.bf16.mxu0 %v4003_v47  ;;  %3011 = vmatprep.subr.bf16.mxu1 %v4006_v48 }
 0x278   :  { %2930 = vmatpush1.bf16.msra.mxu0 %v4001_v49  ;;  %3012 = vmatpush1.bf16.msra.mxu1 %v4004_v50 }
 0x279   :  { %2931 = vmatprep.subr.bf16.mxu0 %v4009_v51  ;;  %3013 = vmatprep.subr.bf16.mxu1 %v4012_v52 }
 0x27c   :  { %2932 = vmatpush1.bf16.msra.mxu0 %v4007_v53  ;;  %3014 = vmatpush1.bf16.msra.mxu1 %v4010_v54 }
 0x27d   :  { %2933 = vmatprep.subr.bf16.mxu0 %v4015_v55  ;;  %3015 = vmatprep.subr.bf16.mxu1 %v4018_v56 }
 0x280   :  { %2934 = vmatpush1.bf16.msra.mxu0 %v4013_v57  ;;  %3016 = vmatpush1.bf16.msra.mxu1 %v4016_v58 }
 0x281   :  { %2935 = vmatprep.subr.bf16.mxu0 %v4021_v59  ;;  %3017 = vmatprep.subr.bf16.mxu1 %v4024_v60 }
 0x284   :  { %2936 = vmatpush1.bf16.msra.mxu0 %v4019_v61  ;;  %3018 = vmatpush1.bf16.msra.mxu1 %v4022_v62  ;;  %v4079_v62 = vld [vmem:[#allocation12 + $0x200] ss:$16 sps:$4 sm:$0xff]  }
 0x285   :  { %2937 = vmatprep.subr.bf16.mxu0 %v4027_v63  ;;  %3019 = vmatprep.subr.bf16.mxu1 %v4030_v0  ;;  %v4082_v63 = vld [vmem:[#allocation12 + $0x208] ss:$16 sps:$4 sm:$0xff]  }
 0x288   :  { %2938 = vmatpush1.bf16.msra.mxu0 %v4025_v1  ;;  %3020 = vmatpush1.bf16.msra.mxu1 %v4028_v2  ;;  %v4087_v2 = vld [vmem:[#allocation12 + $0x224] ss:$16 sps:$4 sm:$0xff]  }
 0x289   :  { %2939 = vmatprep.subr.bf16.mxu0 %v4033_v3  ;;  %3021 = vmatprep.subr.bf16.mxu1 %v4036_v4  ;;  %v4090_v3 = vld [vmem:[#allocation12 + $0x22c] ss:$16 sps:$4 sm:$0xff]  }
 0x28c   :  { %2940 = vmatpush1.bf16.msra.mxu0 %v4031_v5  ;;  %3022 = vmatpush1.bf16.msra.mxu1 %v4034_v6  ;;  %v4085_v5 = vld [vmem:[#allocation12 + $0x220] ss:$16 sps:$4 sm:$0xff]   ;;  %v4088_v6 = vld [vmem:[#allocation12 + $0x228] ss:$16 sps:$4 sm:$0xff]  }
 0x28d   :  { %2941 = vmatprep.subr.bf16.mxu0 %v4039_v7  ;;  %3023 = vmatprep.subr.bf16.mxu1 %v4042_v8  ;;  %v4093_v7 = vld [vmem:[#allocation12 + $0x244] ss:$16 sps:$4 sm:$0xff]   ;;  %v4096_v8 = vld [vmem:[#allocation12 + $0x24c] ss:$16 sps:$4 sm:$0xff]  }
 0x290   :  { %2942 = vmatpush1.bf16.msra.mxu0 %v4037_v9  ;;  %3024 = vmatpush1.bf16.msra.mxu1 %v4040_v10  ;;  %v4091_v9 = vld [vmem:[#allocation12 + $0x240] ss:$16 sps:$4 sm:$0xff]   ;;  %v4094_v10 = vld [vmem:[#allocation12 + $0x248] ss:$16 sps:$4 sm:$0xff]  }
 0x291   :  { %2943 = vmatprep.subr.bf16.mxu0 %v4045_v11  ;;  %3025 = vmatprep.subr.bf16.mxu1 %v4048_v12  ;;  %v4099_v11 = vld [vmem:[#allocation12 + $0x264] ss:$16 sps:$4 sm:$0xff]   ;;  %v4102_v12 = vld [vmem:[#allocation12 + $0x26c] ss:$16 sps:$4 sm:$0xff]  }
 0x294   :  { %2944 = vmatpush1.bf16.msra.mxu0 %v4043_v13  ;;  %3026 = vmatpush1.bf16.msra.mxu1 %v4046_v14  ;;  %v4097_v13 = vld [vmem:[#allocation12 + $0x260] ss:$16 sps:$4 sm:$0xff]   ;;  %v4100_v14 = vld [vmem:[#allocation12 + $0x268] ss:$16 sps:$4 sm:$0xff]  }
 0x295   :  { %2945 = vmatprep.subr.bf16.mxu0 %v4051_v15  ;;  %3027 = vmatprep.subr.bf16.mxu1 %v4054_v17  ;;  %v4105_v15 = vld [vmem:[#allocation12 + $0x284] ss:$16 sps:$4 sm:$0xff]   ;;  %v4108_v17 = vld [vmem:[#allocation12 + $0x28c] ss:$16 sps:$4 sm:$0xff]  }
 0x298   :  { %2946 = vmatpush1.bf16.msra.mxu0 %v4049_v18  ;;  %3028 = vmatpush1.bf16.msra.mxu1 %v4052_v19  ;;  %v4103_v18 = vld [vmem:[#allocation12 + $0x280] ss:$16 sps:$4 sm:$0xff]   ;;  %v4106_v19 = vld [vmem:[#allocation12 + $0x288] ss:$16 sps:$4 sm:$0xff]  }
 0x299   :  { %2947 = vmatprep.subr.bf16.mxu0 %v4057_v20  ;;  %3029 = vmatprep.subr.bf16.mxu1 %v4060_v21  ;;  %v4111_v20 = vld [vmem:[#allocation12 + $0x2a4] ss:$16 sps:$4 sm:$0xff]   ;;  %v4114_v21 = vld [vmem:[#allocation12 + $0x2ac] ss:$16 sps:$4 sm:$0xff]  }
 0x29c   :  { %2948 = vmatpush1.bf16.msra.mxu0 %v4055_v22  ;;  %3030 = vmatpush1.bf16.msra.mxu1 %v4058_v23  ;;  %v4109_v22 = vld [vmem:[#allocation12 + $0x2a0] ss:$16 sps:$4 sm:$0xff]   ;;  %v4112_v23 = vld [vmem:[#allocation12 + $0x2a8] ss:$16 sps:$4 sm:$0xff]  }
 0x29d   :  { %2949 = vmatprep.subr.bf16.mxu0 %v4063_v24  ;;  %3031 = vmatprep.subr.bf16.mxu1 %v4066_v25  ;;  %v4117_v24 = vld [vmem:[#allocation12 + $0x2c4] ss:$16 sps:$4 sm:$0xff]   ;;  %v4120_v25 = vld [vmem:[#allocation12 + $0x2cc] ss:$16 sps:$4 sm:$0xff]  }
 0x2a0   :  { %2950 = vmatpush1.bf16.msra.mxu0 %v4061_v26  ;;  %3032 = vmatpush1.bf16.msra.mxu1 %v4064_v27  ;;  %v4115_v26 = vld [vmem:[#allocation12 + $0x2c0] ss:$16 sps:$4 sm:$0xff]   ;;  %v4118_v27 = vld [vmem:[#allocation12 + $0x2c8] ss:$16 sps:$4 sm:$0xff]  }
 0x2a1   :  { %2951 = vmatprep.subr.bf16.mxu0 %v4069_v28  ;;  %3033 = vmatprep.subr.bf16.mxu1 %v4072_v29  ;;  %v4123_v28 = vld [vmem:[#allocation12 + $0x2e4] ss:$16 sps:$4 sm:$0xff]   ;;  %v4126_v29 = vld [vmem:[#allocation12 + $0x2ec] ss:$16 sps:$4 sm:$0xff]  }
 0x2a4   :  { %2952 = vmatpush1.bf16.msra.mxu0 %v4067_v30  ;;  %3034 = vmatpush1.bf16.msra.mxu1 %v4070_v31  ;;  %v4121_v30 = vld [vmem:[#allocation12 + $0x2e0] ss:$16 sps:$4 sm:$0xff]   ;;  %v4124_v31 = vld [vmem:[#allocation12 + $0x2e8] ss:$16 sps:$4 sm:$0xff]  }
 0x2a5   :  { %2953 = vmatprep.subr.bf16.mxu0 %v4075_v32  ;;  %3035 = vmatprep.subr.bf16.mxu1 %v4078_v33  ;;  %v4129_v32 = vld [vmem:[#allocation12 + $0x304] ss:$16 sps:$4 sm:$0xff]   ;;  %v4132_v33 = vld [vmem:[#allocation12 + $0x30c] ss:$16 sps:$4 sm:$0xff]  }
 0x2a8   :  { %2954 = vmatpush1.bf16.msra.mxu0 %v4073_v34  ;;  %3036 = vmatpush1.bf16.msra.mxu1 %v4076_v35  ;;  %v4127_v34 = vld [vmem:[#allocation12 + $0x300] ss:$16 sps:$4 sm:$0xff]   ;;  %v4130_v35 = vld [vmem:[#allocation12 + $0x308] ss:$16 sps:$4 sm:$0xff]  }
 0x2a9   :  { %2964 = vmatprep.subr.bf16.mxu0 %v4081_v37  ;;  %3046 = vmatprep.subr.bf16.mxu1 %v4084_v38  ;;  %v4135_v37 = vld [vmem:[#allocation12 + $0x324] ss:$16 sps:$4 sm:$0xff]   ;;  %v4138_v38 = vld [vmem:[#allocation12 + $0x32c] ss:$16 sps:$4 sm:$0xff]  }
 0x33e   :  { %v2027_v16 = vpop.f32.mrb[4].mxu0  ;;  %v4545_v46 = vpop.f32.mrb[4].mxu1 }
 0x33f   :  { %v3547_v47 = vadd.f32 %v2027_v16, %v1295_v44  ;;  %v2029_v48 = vpop.f32.mrb[5].mxu0  ;;  %v2111_v49 = vpop.f32.mrb[5].mxu1  ;;  %v4133_v44 = vld [vmem:[#allocation12 + $0x320] ss:$16 sps:$4 sm:$0xff]   ;;  %v4144_v16 = vld [vmem:[#allocation12 + $0x34c] ss:$16 sps:$4 sm:$0xff]  }
 0x340   :  { %v3548_v50 = vadd.f32 %v2029_v48, %v1299_v36  ;;  %v3550_v51 = vadd.f32 %v2111_v49, %v1307_v45  ;;  %v2031_v52 = vpop.f32.mrb[6].mxu0  ;;  %v2113_v53 = vpop.f32.mrb[6].mxu1  ;;  %v4136_v36 = vld [vmem:[#allocation12 + $0x328] ss:$16 sps:$4 sm:$0xff]   ;;  %v4141_v45 = vld [vmem:[#allocation12 + $0x344] ss:$16 sps:$4 sm:$0xff]  }
 0x341   :  { %vm2116_vm6 = vcmp.gt.f32.partialorder %v3547_v47, 0.0  ;;  %v2120_v54 = vmul.f32 0.2, %v3547_v47  ;;  %v2032_v58 = vpop.f32.mrb[7].mxu0  ;;  %v2114_v59 = vpop.f32.mrb[7].mxu1 }
 0x342   :  { %vm2117_vm7 = vcmp.gt.f32.partialorder %v3548_v50, 0.0  ;;  %v2121_v55 = vmul.f32 0.2, %v3548_v50  ;;  %vm2119_vm8 = vcmp.gt.f32.partialorder %v3550_v51, 0.0  ;;  %v2123_v56 = vmul.f32 0.2, %v3550_v51 }
 0x343   :  { %v2124_v57 = vsel %vm2116_vm6, %v3547_v47, %v2120_v54  ;;  %v4139_v47 = vld [vmem:[#allocation12 + $0x340] ss:$16 sps:$4 sm:$0xff]   ;;  %v4142_v48 = vld [vmem:[#allocation12 + $0x348] ss:$16 sps:$4 sm:$0xff]   ;;  %v4147_v49 = vld [vmem:[#allocation12 + $0x364] ss:$16 sps:$4 sm:$0xff]  }
 0x344   :  { %v2125_v60 = vsel %vm2117_vm7, %v3548_v50, %v2121_v55  ;;  %v2127_v0 = vsel %vm2119_vm8, %v3550_v51, %v2123_v56  ;;  %v2128_v1 = vpack.c.bf16 %v2124_v57, %v2124_v57  ;;  %v4150_v50 = vld [vmem:[#allocation12 + $0x36c] ss:$16 sps:$4 sm:$0xff]   ;;  %v4145_v51 = vld [vmem:[#allocation12 + $0x360] ss:$16 sps:$4 sm:$0xff]   ;;  %v4148_v52 = vld [vmem:[#allocation12 + $0x368] ss:$16 sps:$4 sm:$0xff]  }
 0x345   :  { %v2129_v61 = vpack.c.bf16 %v2125_v60, %v2125_v60  ;;  %v2131_v4 = vpack.c.bf16 %v2127_v0, %v2127_v0  ;;  %v4153_v53 = vld [vmem:[#allocation12 + $0x384] ss:$16 sps:$4 sm:$0xff]   ;;  %v4156_v54 = vld [vmem:[#allocation12 + $0x38c] ss:$16 sps:$4 sm:$0xff]   ;;  %v4548_v55 = vsub.s32 2, %v4523_v39 }
 0x346   :  { %v4151_v56 = vld [vmem:[#allocation12 + $0x380] ss:$16 sps:$4 sm:$0xff]   ;;  %v4154_v57 = vld [vmem:[#allocation12 + $0x388] ss:$16 sps:$4 sm:$0xff]   ;;  %v4159_v58 = vld [vmem:[#allocation12 + $0x3a4] ss:$16 sps:$4 sm:$0xff]  }
 0x347   :  { %2955 = vmatprep.mubr.bf16.mxu0 %v2129_v61  ;;  %3037 = vmatprep.mubr.bf16.mxu1 %v2129_v61  ;;  %v4162_v59 = vld [vmem:[#allocation12 + $0x3ac] ss:$16 sps:$4 sm:$0xff]   ;;  %v1303_v60 = vrot.slane %v4531_v41, %v4548_v55  ;;  %v4157_v61 = vld [vmem:[#allocation12 + $0x3a0] ss:$16 sps:$4 sm:$0xff]  }
 0x348   :  { %2956 = vmatmul.mubr.bf16.vlgmr.msra.gmra.mrb[8].mxu0 %v2128_v1  ;;  %3038 = vmatmul.mubr.bf16.vlgmr.msra.gmra.mrb[8].mxu1 %v2128_v1  ;;  %v4168_v39 = vld [vmem:[#allocation12 + $0x3cc] ss:$16 sps:$4 sm:$0xff]   ;;  %v4163_v1 = vld [vmem:[#allocation12 + $0x3c0] ss:$16 sps:$4 sm:$0xff]  }
 0x349   :  { %2965 = vmatpush1.bf16.msra.mxu0 %v4079_v62  ;;  %3047 = vmatpush1.bf16.msra.mxu1 %v4082_v63  ;;  %v4160_v62 = vld [vmem:[#allocation12 + $0x3a8] ss:$16 sps:$4 sm:$0xff]   ;;  %v4165_v63 = vld [vmem:[#allocation12 + $0x3c4] ss:$16 sps:$4 sm:$0xff]   ;;  %v3549_v0 = vadd.f32 %v4545_v46, %v1303_v60  ;;  %v4169_v41 = vld [vmem:[#allocation12 + $0x3e0] ss:$16 sps:$4 sm:$0xff]  }
 0x34a   :  { %2996 = vmatprep.mubr.bf16.mxu0 %v2131_v4  ;;  %3078 = vmatprep.mubr.bf16.mxu1 %v2131_v4  ;;  %v4174_v4 = vld [vmem:[#allocation12 + $0x3ec] ss:$16 sps:$4 sm:$0xff]  }
 0x34b   :  { %2966 = vmatprep.subr.bf16.mxu0 %v4087_v2  ;;  %3048 = vmatprep.subr.bf16.mxu1 %v4090_v3  ;;  %v4166_v2 = vld [vmem:[#allocation12 + $0x3c8] ss:$16 sps:$4 sm:$0xff]   ;;  %v4171_v3 = vld [vmem:[#allocation12 + $0x3e4] ss:$16 sps:$4 sm:$0xff]   ;;  %vm2118_vm9 = vcmp.gt.f32.partialorder %v3549_v0, 0.0 }
 0x34d   :  { %2967 = vmatpush1.bf16.msra.mxu0 %v4085_v5  ;;  %3049 = vmatpush1.bf16.msra.mxu1 %v4088_v6  ;;  %v2122_v5 = vmul.f32 0.2, %v3549_v0  ;;  %v4172_v6 = vld [vmem:[#allocation12 + $0x3e8] ss:$16 sps:$4 sm:$0xff]  }
 0x34e   :  { %2968 = vmatprep.subr.bf16.mxu0 %v4093_v7  ;;  %3050 = vmatprep.subr.bf16.mxu1 %v4096_v8  ;;  %v3418_v8 = vld [vmem:[%s4590_s8 + $0x1] ss:$2 sm:$0xf] }
 0x34f   :  { %v2126_v7 = vsel %vm2118_vm9, %v3549_v0, %v2122_v5 }
 0x350   :  { %v2130_v46 = vpack.c.bf16 %v2126_v7, %v2126_v7 }
 0x351   :  { %2969 = vmatpush1.bf16.msra.mxu0 %v4091_v9  ;;  %3051 = vmatpush1.bf16.msra.mxu1 %v4094_v10  ;;  %v2266_v9 = vrot.slane %v3418_v8, %v4526_v40  ;;  %v2274_v10 = vrot.slane %v3418_v8, %v4548_v55 }
 0x352   :  { %2970 = vmatprep.subr.bf16.mxu0 %v4099_v11  ;;  %3052 = vmatprep.subr.bf16.mxu1 %v4102_v12  ;;  %v2270_v11 = vrot.slane %v3418_v8, %v4534_v42  ;;  %v2278_v12 = vrot.slane %v3418_v8, %v4537_v43 }
 0x355   :  { %2971 = vmatpush1.bf16.msra.mxu0 %v4097_v13  ;;  %3053 = vmatpush1.bf16.msra.mxu1 %v4100_v14  ;;  %v3099_v13 = vld [vmem:[%s4589_s7] sm:$0xf] }
 0x356   :  { %2972 = vmatprep.subr.bf16.mxu0 %v4105_v15  ;;  %3054 = vmatprep.subr.bf16.mxu1 %v4108_v17 }
 0x359   :  { %2973 = vmatpush1.bf16.msra.mxu0 %v4103_v18  ;;  %3055 = vmatpush1.bf16.msra.mxu1 %v4106_v19 }
 0x35a   :  { %2974 = vmatprep.subr.bf16.mxu0 %v4111_v20  ;;  %3056 = vmatprep.subr.bf16.mxu1 %v4114_v21  ;;  %v3104_v21 = vrot.slane %v3099_v13, %v4526_v40 }
 0x35d   :  { %2975 = vmatpush1.bf16.msra.mxu0 %v4109_v22  ;;  %3057 = vmatpush1.bf16.msra.mxu1 %v4112_v23  ;;  %v3108_v23 = vrot.slane %v3099_v13, %v4534_v42 }
 0x35e   :  { %2976 = vmatprep.subr.bf16.mxu0 %v4117_v24  ;;  %3058 = vmatprep.subr.bf16.mxu1 %v4120_v25 }
 0x361   :  { %2977 = vmatpush1.bf16.msra.mxu0 %v4115_v26  ;;  %3059 = vmatpush1.bf16.msra.mxu1 %v4118_v27 }
 0x362   :  { %2978 = vmatprep.subr.bf16.mxu0 %v4123_v28  ;;  %3060 = vmatprep.subr.bf16.mxu1 %v4126_v29 }
 0x365   :  { %2979 = vmatpush1.bf16.msra.mxu0 %v4121_v30  ;;  %3061 = vmatpush1.bf16.msra.mxu1 %v4124_v31 }
 0x366   :  { %2980 = vmatprep.subr.bf16.mxu0 %v4129_v32  ;;  %3062 = vmatprep.subr.bf16.mxu1 %v4132_v33 }
 0x369   :  { %2981 = vmatpush1.bf16.msra.mxu0 %v4127_v34  ;;  %3063 = vmatpush1.bf16.msra.mxu1 %v4130_v35  ;;  %v3112_v34 = vrot.slane %v3099_v13, %v4548_v55 }
 0x36a   :  { %2982 = vmatprep.subr.bf16.mxu0 %v4135_v37  ;;  %3064 = vmatprep.subr.bf16.mxu1 %v4138_v38  ;;  %v3116_v38 = vrot.slane %v3099_v13, %v4537_v43 }
 0x36d   :  { %2983 = vmatpush1.bf16.msra.mxu0 %v4133_v44  ;;  %3065 = vmatpush1.bf16.msra.mxu1 %v4136_v36 }
 0x36e   :  { %2984 = vmatprep.subr.bf16.mxu0 %v4141_v45  ;;  %3066 = vmatprep.subr.bf16.mxu1 %v4144_v16 }
 0x371   :  { %2985 = vmatpush1.bf16.msra.mxu0 %v4139_v47  ;;  %3067 = vmatpush1.bf16.msra.mxu1 %v4142_v48 }
 0x372   :  { %2986 = vmatprep.subr.bf16.mxu0 %v4147_v49  ;;  %3068 = vmatprep.subr.bf16.mxu1 %v4150_v50  ;;  %v3131_v49 = vstv %s4591_s9 }
 0x375   :  { %2987 = vmatpush1.bf16.msra.mxu0 %v4145_v51  ;;  %3069 = vmatpush1.bf16.msra.mxu1 %v4148_v52 }
 0x376   :  { %2988 = vmatprep.subr.bf16.mxu0 %v4153_v53  ;;  %3070 = vmatprep.subr.bf16.mxu1 %v4156_v54 }
 0x379   :  { %2989 = vmatpush1.bf16.msra.mxu0 %v4151_v56  ;;  %3071 = vmatpush1.bf16.msra.mxu1 %v4154_v57 }
 0x37a   :  { %2990 = vmatprep.subr.bf16.mxu0 %v4159_v58  ;;  %3072 = vmatprep.subr.bf16.mxu1 %v4162_v59 }
 0x37d   :  { %2991 = vmatpush1.bf16.msra.mxu0 %v4157_v61  ;;  %3073 = vmatpush1.bf16.msra.mxu1 %v4160_v62 }
 0x37e   :  { %2992 = vmatprep.subr.bf16.mxu0 %v4165_v63  ;;  %3074 = vmatprep.subr.bf16.mxu1 %v4168_v39 }
 0x381   :  { %2993 = vmatpush1.bf16.msra.mxu0 %v4163_v1  ;;  %3075 = vmatpush1.bf16.msra.mxu1 %v4166_v2 }
 0x382   :  { %2994 = vmatprep.subr.bf16.mxu0 %v4171_v3  ;;  %3076 = vmatprep.subr.bf16.mxu1 %v4174_v4 }
 0x385   :  { %2995 = vmatpush1.bf16.msra.mxu0 %v4169_v41  ;;  %3077 = vmatpush1.bf16.msra.mxu1 %v4172_v6 }
 0x388   :  { %2997 = vmatmul.mubr.bf16.vlgmr.msra.gmra.mrb[8].mxu0 %v2130_v46  ;;  %3079 = vmatmul.mubr.bf16.vlgmr.msra.gmra.mrb[8].mxu1 %v2130_v46 }
 0x45b   :  { %v2998_v14 = vpop.f32.mrb[8].mxu0  ;;  %v3080_v15 = vpop.f32.mrb[8].mxu1 }
 0x45c   :  { %v3551_v17 = vadd.f32 %v2998_v14, %v2266_v9  ;;  %v3553_v18 = vadd.f32 %v3080_v15, %v2274_v10  ;;  %v3000_v19 = vpop.f32.mrb[9].mxu0  ;;  %v3082_v20 = vpop.f32.mrb[9].mxu1 }
 0x45d   :  { %v3552_v22 = vadd.f32 %v3000_v19, %v2270_v11  ;;  %v3554_v24 = vadd.f32 %v3082_v20, %v2278_v12  ;;  %v3002_v25 = vpop.f32.mrb[10].mxu0  ;;  %v3084_v26 = vpop.f32.mrb[10].mxu1 }
 0x45e   :  { %vm3087_vm10 = vcmp.gt.f32.partialorder %v3551_v17, 0.0  ;;  %v3091_v27 = vmul.f32 0.2, %v3551_v17  ;;  %vm3089_vm11 = vcmp.gt.f32.partialorder %v3553_v18, 0.0  ;;  %v3093_v28 = vmul.f32 0.2, %v3553_v18 }
 0x45f   :  { %vm3088_vm12 = vcmp.gt.f32.partialorder %v3552_v22, 0.0  ;;  %v3092_v29 = vmul.f32 0.2, %v3552_v22  ;;  %v3094_v30 = vmul.f32 0.2, %v3554_v24  ;;  %vm3090_vm13 = vcmp.gt.f32.partialorder %v3554_v24, 0.0 }
 0x460   :  { %v3095_v31 = vsel %vm3087_vm10, %v3551_v17, %v3091_v27  ;;  %v3003_v32 = vpop.f32.mrb[11].mxu0  ;;  %v3085_v33 = vpop.f32.mrb[11].mxu1  ;;  %v3097_v35 = vsel %vm3089_vm11, %v3553_v18, %v3093_v28 }
 0x461   :  { %v3121_v40 = vmul.f32 %v3104_v21, %v3095_v31  ;;  %v3096_v37 = vsel %vm3088_vm12, %v3552_v22, %v3092_v29  ;;  %v3098_v44 = vsel %vm3090_vm13, %v3554_v24, %v3094_v30  ;;  %v3123_v36 = vmul.f32 %v3112_v34, %v3097_v35 }
 0x462   :  { %v3122_v42 = vmul.f32 %v3108_v23, %v3096_v37  ;;  %v3124_v16 = vmul.f32 %v3116_v38, %v3098_v44 }
 0x464   :  { %v3125_v45 = vadd.f32 %v3122_v42, %v3121_v40 }
 0x466   :  { %v3126_v47 = vadd.f32 %v3125_v45, %v3123_v36 }
 0x468   :  { %v3127_v48 = vadd.f32 %v3126_v47, %v3124_v16 }
 0x46a   :  { %3128 = vadd.xlane.f32.xlu0 %v3127_v48 }
 0x4f7   :  { %v3129_v50 = vpop.xlane.xlu0 %3128 }
 0x4f8   :  { %v3132_v51 = vadd.f32 %v3131_v49, %v3129_v50 }
 0x4fa   :  { %v3133_v52 = vpack.c.bf16 %v3132_v51, %v3132_v51 }
 0x4fc   :  { %3134 = vst [vmem:[#allocation14] sm:$0xf] %v3133_v52 }
 0x4fd   :  { %4318 = shalt.err (!%p4315_p10)
}
 0x4fe   :  { %s4319_s3 = scalar_lea.hbm %s4592_s10, 64 }
 0x4ff   :  { %p4320_p11 = scmp.ne.s32.totalorder %s4592_s10, %s4319_s3  ;;  %p4323_p12 = scmp.lt.u32.totalorder %s4319_s3, %s4592_s10 }
 0x501   :  { %p4325_p13 = pnand %p4323_p12, %p4320_p11 }
 0x503   :  { %4328 = shalt.err (!%p4325_p13)
}
 0x504   :  { %3144 = dma.vmem_to_hbm [thread:$0]  %s3142_s11, 64, %s4592_s10, [#allocation5]  }
 0x505   :  { %4337 = dma.done.wait [#allocation5], 64  }
 0x506   :  { %4338 = vsyncadd [#allocation5], 4294967232 }
 0x507   :  { %3148 = vsyncpa [#allocation4], 1 }
 0x508   :  { %3149 = vsyncpa [#allocation7], 1 }
 0x509   :  { %3150 = vsyncpa [#allocation10], 1 }
 0x50a   :  { %3151 = vsyncpa [#allocation13], 1 }
 0x50b   :  { %3152 = vsyncpa [#allocation5], 1 }

</bundles_post_ra>
